<compile_context>
chip_gen: v7x
topology: tpu7x:2x2x1
jax: 0.10.0
libtpu: 0.0.40
codegen_flags: <defaults>
</compile_context>

<pallas_src>
import functools
import math

import jax
import jax.numpy as jnp
from jax.experimental import pallas as pl
from jax.experimental.pallas import tpu as pltpu

_EPS = 1e-6


# ---------------------------------------------------------------------------
# Pallas kernels
# ---------------------------------------------------------------------------
def _layernorm_rows(x, a, b, eps, feat_dim):
    # Annotated-Transformer LayerNorm: a*(x-mean)/(std+eps)+b, unbiased std.
    mean = jnp.mean(x, axis=-1, keepdims=True)
    var = jnp.sum((x - mean) ** 2, axis=-1, keepdims=True) * (1.0 / (feat_dim - 1))
    std = jnp.sqrt(var)
    inv = pl.reciprocal(std + eps, approx=True)
    return a * (x - mean) * inv + b


def _ln_linear_kernel(x_ref, a_ref, b_ref, w_ref, bias_ref, o_ref, *, eps, feat_dim):
    # Fused pre-LayerNorm + linear projection (used for the fused QKV matmul).
    # x: (tm, D) f32   w: (D, N) bf16   bias: (1, N) f32   o: (tm, N) f32
    xn = _layernorm_rows(x_ref[...], a_ref[...], b_ref[...], eps, feat_dim)
    y = jnp.dot(xn.astype(jnp.bfloat16), w_ref[...],
                preferred_element_type=jnp.float32)
    o_ref[...] = y + bias_ref[...]


def _attention_kernel(qkv_ref, mask_ref, o_ref, *, num_heads, scale):
    # qkv: (S, 3D) f32   mask: (1, S) additive f32 (0 valid / -1e9 pad)
    # o:   (S, D)  f32   — all heads of one batch element per grid step.
    S, D3 = qkv_ref.shape
    D = D3 // 3
    dk = D // num_heads
    qkv = qkv_ref[...]
    add_mask = mask_ref[...]                                     # (1, S)
    parts = []
    for h in range(num_heads):                                   # static unroll
        q = qkv[:, h * dk:(h + 1) * dk].astype(jnp.bfloat16)
        k = qkv[:, D + h * dk:D + (h + 1) * dk].astype(jnp.bfloat16)
        v = qkv[:, 2 * D + h * dk:2 * D + (h + 1) * dk].astype(jnp.bfloat16)
        s = jax.lax.dot_general(
            q, k, (((1,), (1,)), ((), ())),
            preferred_element_type=jnp.float32) * scale           # (S, S) f32
        s = s + add_mask
        s = s - jnp.max(s, axis=-1, keepdims=True)
        p = jnp.exp(s)
        p = p * pl.reciprocal(jnp.sum(p, axis=-1, keepdims=True), approx=True)
        parts.append(jnp.dot(p.astype(jnp.bfloat16), v,
                             preferred_element_type=jnp.float32))
    o_ref[...] = jnp.concatenate(parts, axis=-1)                  # lane-dense store


def _linear_residual_kernel(x_ref, w_ref, b_ref, res_ref, o_ref):
    # Output projection with fused residual add: o = res + x @ W + b
    y = jnp.dot(x_ref[...].astype(jnp.bfloat16), w_ref[...],
                preferred_element_type=jnp.float32)
    o_ref[...] = res_ref[...] + y + b_ref[...]


def _ln_ffn_residual_kernel(x_ref, a_ref, b_ref, w1_ref, b1_ref, w2_ref, b2_ref,
                            o_ref, *, eps, feat_dim):
    # Fused: o = x + W2 @ relu(W1 @ LN(x) + b1) + b2 ; (tm, d_ff) stays in VMEM.
    x = x_ref[...]
    xn = _layernorm_rows(x, a_ref[...], b_ref[...], eps, feat_dim)
    h = jnp.dot(xn.astype(jnp.bfloat16), w1_ref[...],
                preferred_element_type=jnp.float32) + b1_ref[...]
    h = jnp.maximum(h, 0.0)
    y = jnp.dot(h.astype(jnp.bfloat16), w2_ref[...],
                preferred_element_type=jnp.float32) + b2_ref[...]
    o_ref[...] = x + y


def _layernorm_kernel(x_ref, a_ref, b_ref, o_ref, *, eps, feat_dim):
    o_ref[...] = _layernorm_rows(x_ref[...], a_ref[...], b_ref[...], eps, feat_dim)


# ---------------------------------------------------------------------------
# Pallas wrappers
# ---------------------------------------------------------------------------
_PARALLEL_1D = pltpu.CompilerParams(dimension_semantics=("parallel",))


def _pick_tm(m, cap=256):
    """Largest legal row tile <= cap (multiple of 8, divides m) else full m."""
    if m <= cap:
        return m
    for t in range(cap, 7, -1):
        if m % t == 0 and t % 8 == 0:
            return t
    return m


def _full_spec(shape):
    return pl.BlockSpec(shape, lambda i: tuple(0 for _ in shape))


def ln_linear_pallas(x2d, a, b, w, bias):
    M, D = x2d.shape
    N = w.shape[1]
    tm = _pick_tm(M)
    kern = functools.partial(_ln_linear_kernel, eps=_EPS, feat_dim=D)
    return pl.pallas_call(
        kern,
        out_shape=jax.ShapeDtypeStruct((M, N), jnp.float32),
        grid=(M // tm,),
        in_specs=[
            pl.BlockSpec((tm, D), lambda i: (i, 0)),
            _full_spec((1, D)), _full_spec((1, D)),
            _full_spec((D, N)), _full_spec((1, N)),
        ],
        out_specs=pl.BlockSpec((tm, N), lambda i: (i, 0)),
        compiler_params=_PARALLEL_1D,
    )(x2d, a, b, w, bias)


def attention_pallas(qkv, add_mask, num_heads):
    # qkv: (B, S, 3D) f32, add_mask: (B, 1, S) f32 -> (B, S, D) f32
    B, S, D3 = qkv.shape
    D = D3 // 3
    dk = D // num_heads
    kern = functools.partial(_attention_kernel, num_heads=num_heads,
                             scale=1.0 / math.sqrt(dk))
    return pl.pallas_call(
        kern,
        out_shape=jax.ShapeDtypeStruct((B, S, D), jnp.float32),
        grid=(B,),
        in_specs=[
            pl.BlockSpec((None, S, D3), lambda bidx: (bidx, 0, 0)),
            pl.BlockSpec((None, 1, S), lambda bidx: (bidx, 0, 0)),
        ],
        out_specs=pl.BlockSpec((None, S, D), lambda bidx: (bidx, 0, 0)),
        compiler_params=_PARALLEL_1D,
    )(qkv, add_mask)


def linear_residual_pallas(x2d, w, b, res2d):
    M, K = x2d.shape
    N = w.shape[1]
    tm = _pick_tm(M)
    return pl.pallas_call(
        _linear_residual_kernel,
        out_shape=jax.ShapeDtypeStruct((M, N), jnp.float32),
        grid=(M // tm,),
        in_specs=[
            pl.BlockSpec((tm, K), lambda i: (i, 0)),
            _full_spec((K, N)), _full_spec((1, N)),
            pl.BlockSpec((tm, N), lambda i: (i, 0)),
        ],
        out_specs=pl.BlockSpec((tm, N), lambda i: (i, 0)),
        compiler_params=_PARALLEL_1D,
    )(x2d, w, b, res2d)


def ln_ffn_residual_pallas(x2d, a, b, w1, b1, w2, b2):
    M, D = x2d.shape
    DFF = w1.shape[1]
    tm = _pick_tm(M)
    kern = functools.partial(_ln_ffn_residual_kernel, eps=_EPS, feat_dim=D)
    return pl.pallas_call(
        kern,
        out_shape=jax.ShapeDtypeStruct((M, D), jnp.float32),
        grid=(M // tm,),
        in_specs=[
            pl.BlockSpec((tm, D), lambda i: (i, 0)),
            _full_spec((1, D)), _full_spec((1, D)),
            _full_spec((D, DFF)), _full_spec((1, DFF)),
            _full_spec((DFF, D)), _full_spec((1, D)),
        ],
        out_specs=pl.BlockSpec((tm, D), lambda i: (i, 0)),
        compiler_params=_PARALLEL_1D,
    )(x2d, a, b, w1, b1, w2, b2)


def layernorm_pallas(x2d, a, b):
    M, D = x2d.shape
    tm = _pick_tm(M)
    kern = functools.partial(_layernorm_kernel, eps=_EPS, feat_dim=D)
    return pl.pallas_call(
        kern,
        out_shape=jax.ShapeDtypeStruct((M, D), jnp.float32),
        grid=(M // tm,),
        in_specs=[
            pl.BlockSpec((tm, D), lambda i: (i, 0)),
            _full_spec((1, D)), _full_spec((1, D)),
        ],
        out_specs=pl.BlockSpec((tm, D), lambda i: (i, 0)),
        compiler_params=_PARALLEL_1D,
    )(x2d, a, b)


# ---------------------------------------------------------------------------
# Model glue (plain JAX; hot path in Pallas)
# ---------------------------------------------------------------------------
def positional_encoding(seq_len, d_model):
    pos = jnp.arange(seq_len, dtype=jnp.float32)[:, None]
    div = jnp.exp(
        jnp.arange(0, d_model, 2, dtype=jnp.float32) * -(math.log(10000.0) / d_model)
    )
    pe = jnp.zeros((seq_len, d_model), jnp.float32)
    pe = pe.at[:, 0::2].set(jnp.sin(pos * div))
    pe = pe.at[:, 1::2].set(jnp.cos(pos * div))
    return pe


def encoder_layer(x, add_mask, p, num_heads):
    B, S, D = x.shape
    M = B * S
    x2 = x.reshape(M, D)
    # Sublayer 0: x + self_attn(LayerNorm(x))   (LN fused into QKV projection)
    qkv = ln_linear_pallas(x2, p["ln1_a"], p["ln1_b"], p["w_qkv"], p["b_qkv"])
    ctx = attention_pallas(qkv.reshape(B, S, 3 * D), add_mask, num_heads)
    x2 = linear_residual_pallas(ctx.reshape(M, D), p["wo"], p["bo"], x2)
    # Sublayer 1: x + ff(LayerNorm(x))          (LN + W1 + ReLU + W2 + residual fused)
    x2 = ln_ffn_residual_pallas(x2, p["ln2_a"], p["ln2_b"],
                                p["w1"], p["b1"], p["w2"], p["b2"])
    return x2.reshape(B, S, D)


def transformer_encoder_forward(emb_batch, masks, params, num_heads):
    """emb_batch: (B, S, D) float32, masks: (B, S) float32 (1 valid / 0 pad)."""
    B, S, D = emb_batch.shape
    # masks.unsqueeze(1) -> additive f32 mask: 0 for valid keys, -1e9 for padding.
    add_mask = (masks[:, None, :] - 1.0) * 1e9                       # (B, 1, S)
    x = emb_batch + positional_encoding(S, D)[None, :, :]            # PositionalEncoding
    for lp in params["layers"]:
        x = encoder_layer(x, add_mask, lp, num_heads)
    x2 = layernorm_pallas(x.reshape(B * S, D), params["final_a"], params["final_b"])
    return x2.reshape(B, S, D)


# ---------------------------------------------------------------------------
# Deterministic parameter init (xavier_uniform for dim>1) + bf16/fused packing
# ---------------------------------------------------------------------------
def xavier_uniform(key, shape):
    fan_in, fan_out = shape[0], shape[1]
    bound = math.sqrt(6.0 / (fan_in + fan_out))
    return jax.random.uniform(key, shape, jnp.float32, -bound, bound)


def init_params(key, d_model, d_ff, num_layers):
    layers = []
    for _ in range(num_layers):
        keys = jax.random.split(key, 11)
        key = keys[0]
        lp = {
            "wq": xavier_uniform(keys[1], (d_model, d_model)),
            "wk": xavier_uniform(keys[2], (d_model, d_model)),
            "wv": xavier_uniform(keys[3], (d_model, d_model)),
            "wo": xavier_uniform(keys[4], (d_model, d_model)),
            "bq": jax.random.uniform(keys[5], (d_model,), jnp.float32, -0.1, 0.1),
            "bk": jax.random.uniform(keys[6], (d_model,), jnp.float32, -0.1, 0.1),
            "bv": jax.random.uniform(keys[7], (d_model,), jnp.float32, -0.1, 0.1),
            "bo": jnp.zeros((d_model,), jnp.float32),
            "w1": xavier_uniform(keys[8], (d_model, d_ff)),
            "b1": jax.random.uniform(keys[9], (d_ff,), jnp.float32, -0.1, 0.1),
            "w2": xavier_uniform(keys[10], (d_ff, d_model)),
            "b2": jnp.zeros((d_model,), jnp.float32),
            "ln1_a": jnp.ones((d_model,), jnp.float32),
            "ln1_b": jnp.zeros((d_model,), jnp.float32),
            "ln2_a": jnp.ones((d_model,), jnp.float32),
            "ln2_b": jnp.zeros((d_model,), jnp.float32),
        }
        layers.append(lp)
    return {
        "layers": layers,
        "final_a": jnp.ones((d_model,), jnp.float32),
        "final_b": jnp.zeros((d_model,), jnp.float32),
    }


def prepare_params(raw, d_model, d_ff):
    """Concatenate QKV weights, cast matmul weights to bf16, reshape vectors to (1,N)."""
    bf16 = jnp.bfloat16
    layers = []
    for lp in raw["layers"]:
        layers.append({
            "w_qkv": jnp.concatenate([lp["wq"], lp["wk"], lp["wv"]], axis=1).astype(bf16),
            "b_qkv": jnp.concatenate([lp["bq"], lp["bk"], lp["bv"]]).reshape(1, 3 * d_model),
            "wo": lp["wo"].astype(bf16),
            "bo": lp["bo"].reshape(1, d_model),
            "w1": lp["w1"].astype(bf16),
            "b1": lp["b1"].reshape(1, d_ff),
            "w2": lp["w2"].astype(bf16),
            "b2": lp["b2"].reshape(1, d_model),
            "ln1_a": lp["ln1_a"].reshape(1, d_model),
            "ln1_b": lp["ln1_b"].reshape(1, d_model),
            "ln2_a": lp["ln2_a"].reshape(1, d_model),
            "ln2_b": lp["ln2_b"].reshape(1, d_model),
        })
    return {
        "layers": layers,
        "final_a": raw["final_a"].reshape(1, d_model),
        "final_b": raw["final_b"].reshape(1, d_model),
    }


if __name__ == "__main__":
    # Small shapes consistent with forward(emb_batch (B,S,D), masks (B,S)).
    B, S, D = 2, 8, 64
    NUM_HEADS = 8
    D_FF = 128
    NUM_LAYERS = 2

    key = jax.random.PRNGKey(0)
    k_x, k_p = jax.random.split(key)
    emb_batch = jax.random.normal(k_x, (B, S, D), jnp.float32)
    # masks: 1 for valid tokens, 0 for padding (second sequence has length 6).
    lengths = jnp.array([S, 6])
    masks = (jnp.arange(S)[None, :] < lengths[:, None]).astype(jnp.float32)

    params = prepare_params(init_params(k_p, D, D_FF, NUM_LAYERS), D, D_FF)

    fwd = jax.jit(functools.partial(transformer_encoder_forward, num_heads=NUM_HEADS))
    out = jax.block_until_ready(fwd(emb_batch, masks, params))
    assert out.shape == (B, S, D) and out.dtype == jnp.float32
    assert bool(jnp.all(jnp.isfinite(out)))
    print("KERNEL_OK")
</pallas_src>

<mosaic_0001>
module attributes {stable_mosaic.version = 11 : i64} {
  func.func @_ln_linear_kernel(%arg0: i32, %arg1: memref<16x64xf32, #tpu.memory_space<vmem>>, %arg2: memref<1x64xf32, #tpu.memory_space<vmem>>, %arg3: memref<1x64xf32, #tpu.memory_space<vmem>>, %arg4: memref<64x192xbf16, #tpu.memory_space<vmem>>, %arg5: memref<1x192xf32, #tpu.memory_space<vmem>>, %arg6: memref<16x192xf32, #tpu.memory_space<vmem>>) attributes {dimension_semantics = [#tpu.dimension_semantics<parallel>], iteration_bounds = array<i64: 1>, scalar_prefetch = 0 : i64, scratch_operands = 0 : i64, tpu.core_type = #tpu.core_type<tc>, window_params = [{transform_indices = @transform_0, window_bounds = array<i64: 16, 64>}, {pipeline_mode = #tpu.pipeline_mode<synchronous>, transform_indices = @transform_1, window_bounds = array<i64: 1, 64>}, {pipeline_mode = #tpu.pipeline_mode<synchronous>, transform_indices = @transform_2, window_bounds = array<i64: 1, 64>}, {pipeline_mode = #tpu.pipeline_mode<synchronous>, transform_indices = @transform_3, window_bounds = array<i64: 64, 192>}, {pipeline_mode = #tpu.pipeline_mode<synchronous>, transform_indices = @transform_4, window_bounds = array<i64: 1, 192>}, {transform_indices = @transform_5, window_bounds = array<i64: 16, 192>}]} {
    %c0 = arith.constant 0 : index
    %c0_0 = arith.constant 0 : index
    %0 = vector.load %arg1[%c0, %c0_0] : memref<16x64xf32, #tpu.memory_space<vmem>>, vector<16x64xf32>
    %c0_1 = arith.constant 0 : index
    %c0_2 = arith.constant 0 : index
    %1 = vector.load %arg2[%c0_1, %c0_2] : memref<1x64xf32, #tpu.memory_space<vmem>>, vector<1x64xf32>
    %c0_3 = arith.constant 0 : index
    %c0_4 = arith.constant 0 : index
    %2 = vector.load %arg3[%c0_3, %c0_4] : memref<1x64xf32, #tpu.memory_space<vmem>>, vector<1x64xf32>
    %cst = arith.constant dense<0.000000e+00> : vector<16xf32>
    %3 = vector.multi_reduction <add>, %0, %cst [1] : vector<16x64xf32> to vector<16xf32>
    %4 = vector.shape_cast %3 : vector<16xf32> to vector<16x1xf32>
    %cst_5 = arith.constant 6.400000e+01 : f32
    %5 = vector.broadcast %cst_5 : f32 to vector<16x1xf32>
    %6 = arith.divf %4, %5 : vector<16x1xf32>
    %7 = vector.broadcast %6 : vector<16x1xf32> to vector<16x64xf32>
    %8 = arith.subf %0, %7 : vector<16x64xf32>
    %9 = arith.mulf %8, %8 : vector<16x64xf32>
    %cst_6 = arith.constant dense<0.000000e+00> : vector<16xf32>
    %10 = vector.multi_reduction <add>, %9, %cst_6 [1] : vector<16x64xf32> to vector<16xf32>
    %11 = vector.shape_cast %10 : vector<16xf32> to vector<16x1xf32>
    %cst_7 = arith.constant 0.0158730168 : f32
    %12 = vector.broadcast %cst_7 : f32 to vector<16x1xf32>
    %13 = arith.mulf %11, %12 : vector<16x1xf32>
    %14 = math.sqrt %13 : vector<16x1xf32>
    %cst_8 = arith.constant 9.99999997E-7 : f32
    %15 = vector.broadcast %cst_8 : f32 to vector<16x1xf32>
    %16 = arith.addf %14, %15 : vector<16x1xf32>
    %17 = tpu.reciprocal %16 {approx = true} : vector<16x1xf32> -> vector<16x1xf32>
    %18 = vector.broadcast %6 : vector<16x1xf32> to vector<16x64xf32>
    %19 = arith.subf %0, %18 : vector<16x64xf32>
    %20 = vector.broadcast %1 : vector<1x64xf32> to vector<16x64xf32>
    %21 = arith.mulf %20, %19 : vector<16x64xf32>
    %22 = vector.broadcast %17 : vector<16x1xf32> to vector<16x64xf32>
    %23 = arith.mulf %21, %22 : vector<16x64xf32>
    %24 = vector.broadcast %2 : vector<1x64xf32> to vector<16x64xf32>
    %25 = arith.addf %23, %24 : vector<16x64xf32>
    %26 = arith.truncf %25 : vector<16x64xf32> to vector<16x64xbf16>
    %c0_9 = arith.constant 0 : index
    %c0_10 = arith.constant 0 : index
    %27 = vector.load %arg4[%c0_9, %c0_10] : memref<64x192xbf16, #tpu.memory_space<vmem>>, vector<64x192xbf16>
    %cst_11 = arith.constant dense<0.000000e+00> : vector<16x192xf32>
    %28 = tpu.matmul %26, %27, %cst_11 {dimension_numbers = #tpu.dot_dimension_numbers<[1], [0], [0], [1], [0, 0, 1, 1], [], []>} : vector<16x64xbf16>, vector<64x192xbf16>, vector<16x192xf32> -> vector<16x192xf32>
    %c0_12 = arith.constant 0 : index
    %c0_13 = arith.constant 0 : index
    %29 = vector.load %arg5[%c0_12, %c0_13] : memref<1x192xf32, #tpu.memory_space<vmem>>, vector<1x192xf32>
    %30 = vector.broadcast %29 : vector<1x192xf32> to vector<16x192xf32>
    %31 = arith.addf %28, %30 : vector<16x192xf32>
    %c0_14 = arith.constant 0 : index
    %c0_15 = arith.constant 0 : index
    %32 = vector.load %arg6[%c0_14, %c0_15] : memref<16x192xf32, #tpu.memory_space<vmem>>, vector<16x192xf32>
    tpu.vector_store %arg6[%c0_14, %c0_15], %31 {strides = array<i32>} : memref<16x192xf32, #tpu.memory_space<vmem>>, vector<16x192xf32>,
    return
  }
  func.func @transform_0(%arg0: i32) -> (i32, i32) {
    %c0_i32 = arith.constant 0 : i32
    %c0_i32_0 = arith.constant 0 : i32
    return %arg0, %c0_i32 : i32, i32
  }
  func.func @transform_1(%arg0: i32) -> (i32, i32) {
    %c0_i32 = arith.constant 0 : i32
    %c0_i32_0 = arith.constant 0 : i32
    %c0_i32_1 = arith.constant 0 : i32
    return %c0_i32, %c0_i32_0 : i32, i32
  }
  func.func @transform_2(%arg0: i32) -> (i32, i32) {
    %c0_i32 = arith.constant 0 : i32
    %c0_i32_0 = arith.constant 0 : i32
    %c0_i32_1 = arith.constant 0 : i32
    return %c0_i32, %c0_i32_0 : i32, i32
  }
  func.func @transform_3(%arg0: i32) -> (i32, i32) {
    %c0_i32 = arith.constant 0 : i32
    %c0_i32_0 = arith.constant 0 : i32
    %c0_i32_1 = arith.constant 0 : i32
    return %c0_i32, %c0_i32_0 : i32, i32
  }
  func.func @transform_4(%arg0: i32) -> (i32, i32) {
    %c0_i32 = arith.constant 0 : i32
    %c0_i32_0 = arith.constant 0 : i32
    %c0_i32_1 = arith.constant 0 : i32
    return %c0_i32, %c0_i32_0 : i32, i32
  }
  func.func @transform_5(%arg0: i32) -> (i32, i32) {
    %c0_i32 = arith.constant 0 : i32
    %c0_i32_0 = arith.constant 0 : i32
    return %arg0, %c0_i32 : i32, i32
  }
}

module attributes {stable_mosaic.version = 11 : i64} {
  func.func @_attention_kernel(%arg0: i32, %arg1: memref<1x8x192xf32, #tpu.memory_space<vmem>>, %arg2: memref<1x1x8xf32, #tpu.memory_space<vmem>>, %arg3: memref<1x8x64xf32, #tpu.memory_space<vmem>>) attributes {dimension_semantics = [#tpu.dimension_semantics<parallel>], iteration_bounds = array<i64: 2>, scalar_prefetch = 0 : i64, scratch_operands = 0 : i64, tpu.core_type = #tpu.core_type<tc>, window_params = [{transform_indices = @transform_0, window_bounds = array<i64: 1, 8, 192>}, {transform_indices = @transform_1, window_bounds = array<i64: 1, 1, 8>}, {transform_indices = @transform_2, window_bounds = array<i64: 1, 8, 64>}]} {
    %c0 = arith.constant 0 : index
    %c0_0 = arith.constant 0 : index
    %c0_1 = arith.constant 0 : index
    %0 = vector.load %arg1[%c0, %c0_0, %c0_1] : memref<1x8x192xf32, #tpu.memory_space<vmem>>, vector<1x8x192xf32>
    %1 = vector.shape_cast %0 : vector<1x8x192xf32> to vector<8x192xf32>
    %c0_2 = arith.constant 0 : index
    %c0_3 = arith.constant 0 : index
    %c0_4 = arith.constant 0 : index
    %2 = vector.load %arg2[%c0_2, %c0_3, %c0_4] : memref<1x1x8xf32, #tpu.memory_space<vmem>>, vector<1x1x8xf32>
    %3 = vector.shape_cast %2 : vector<1x1x8xf32> to vector<1x8xf32>
    %4 = vector.extract_strided_slice %1 {offsets = [0, 0], sizes = [8, 8], strides = [1, 1]} : vector<8x192xf32> to vector<8x8xf32>
    %5 = arith.truncf %4 : vector<8x8xf32> to vector<8x8xbf16>
    %6 = vector.extract_strided_slice %1 {offsets = [0, 64], sizes = [8, 8], strides = [1, 1]} : vector<8x192xf32> to vector<8x8xf32>
    %7 = arith.truncf %6 : vector<8x8xf32> to vector<8x8xbf16>
    %8 = vector.extract_strided_slice %1 {offsets = [0, 128], sizes = [8, 8], strides = [1, 1]} : vector<8x192xf32> to vector<8x8xf32>
    %9 = arith.truncf %8 : vector<8x8xf32> to vector<8x8xbf16>
    %cst = arith.constant dense<0.000000e+00> : vector<8x8xf32>
    %10 = tpu.matmul %5, %7, %cst {dimension_numbers = #tpu.dot_dimension_numbers<[1], [1], [0], [0], [0, 0, 1, 0], [], []>} : vector<8x8xbf16>, vector<8x8xbf16>, vector<8x8xf32> -> vector<8x8xf32>
    %cst_5 = arith.constant 0.353553385 : f32
    %11 = vector.broadcast %cst_5 : f32 to vector<8x8xf32>
    %12 = arith.mulf %10, %11 : vector<8x8xf32>
    %13 = vector.broadcast %3 : vector<1x8xf32> to vector<8x8xf32>
    %14 = arith.addf %12, %13 : vector<8x8xf32>
    %cst_6 = arith.constant dense<0xFF800000> : vector<8xf32>
    %15 = vector.multi_reduction <maximumf>, %14, %cst_6 [1] : vector<8x8xf32> to vector<8xf32>
    %16 = vector.shape_cast %15 : vector<8xf32> to vector<8x1xf32>
    %17 = vector.broadcast %16 : vector<8x1xf32> to vector<8x8xf32>
    %18 = arith.subf %14, %17 : vector<8x8xf32>
    %19 = math.exp %18 : vector<8x8xf32>
    %cst_7 = arith.constant dense<0.000000e+00> : vector<8xf32>
    %20 = vector.multi_reduction <add>, %19, %cst_7 [1] : vector<8x8xf32> to vector<8xf32>
    %21 = vector.shape_cast %20 : vector<8xf32> to vector<8x1xf32>
    %22 = tpu.reciprocal %21 {approx = true} : vector<8x1xf32> -> vector<8x1xf32>
    %23 = vector.broadcast %22 : vector<8x1xf32> to vector<8x8xf32>
    %24 = arith.mulf %19, %23 : vector<8x8xf32>
    %25 = arith.truncf %24 : vector<8x8xf32> to vector<8x8xbf16>
    %cst_8 = arith.constant dense<0.000000e+00> : vector<8x8xf32>
    %26 = tpu.matmul %25, %9, %cst_8 {dimension_numbers = #tpu.dot_dimension_numbers<[1], [0], [0], [1], [0, 0, 1, 1], [], []>} : vector<8x8xbf16>, vector<8x8xbf16>, vector<8x8xf32> -> vector<8x8xf32>
    %27 = vector.extract_strided_slice %1 {offsets = [0, 8], sizes = [8, 8], strides = [1, 1]} : vector<8x192xf32> to vector<8x8xf32>
    %28 = arith.truncf %27 : vector<8x8xf32> to vector<8x8xbf16>
    %29 = vector.extract_strided_slice %1 {offsets = [0, 72], sizes = [8, 8], strides = [1, 1]} : vector<8x192xf32> to vector<8x8xf32>
    %30 = arith.truncf %29 : vector<8x8xf32> to vector<8x8xbf16>
    %31 = vector.extract_strided_slice %1 {offsets = [0, 136], sizes = [8, 8], strides = [1, 1]} : vector<8x192xf32> to vector<8x8xf32>
    %32 = arith.truncf %31 : vector<8x8xf32> to vector<8x8xbf16>
    %cst_9 = arith.constant dense<0.000000e+00> : vector<8x8xf32>
    %33 = tpu.matmul %28, %30, %cst_9 {dimension_numbers = #tpu.dot_dimension_numbers<[1], [1], [0], [0], [0, 0, 1, 0], [], []>} : vector<8x8xbf16>, vector<8x8xbf16>, vector<8x8xf32> -> vector<8x8xf32>
    %cst_10 = arith.constant 0.353553385 : f32
    %34 = vector.broadcast %cst_10 : f32 to vector<8x8xf32>
    %35 = arith.mulf %33, %34 : vector<8x8xf32>
    %36 = vector.broadcast %3 : vector<1x8xf32> to vector<8x8xf32>
    %37 = arith.addf %35, %36 : vector<8x8xf32>
    %cst_11 = arith.constant dense<0xFF800000> : vector<8xf32>
    %38 = vector.multi_reduction <maximumf>, %37, %cst_11 [1] : vector<8x8xf32> to vector<8xf32>
    %39 = vector.shape_cast %38 : vector<8xf32> to vector<8x1xf32>
    %40 = vector.broadcast %39 : vector<8x1xf32> to vector<8x8xf32>
    %41 = arith.subf %37, %40 : vector<8x8xf32>
    %42 = math.exp %41 : vector<8x8xf32>
    %cst_12 = arith.constant dense<0.000000e+00> : vector<8xf32>
    %43 = vector.multi_reduction <add>, %42, %cst_12 [1] : vector<8x8xf32> to vector<8xf32>
    %44 = vector.shape_cast %43 : vector<8xf32> to vector<8x1xf32>
    %45 = tpu.reciprocal %44 {approx = true} : vector<8x1xf32> -> vector<8x1xf32>
    %46 = vector.broadcast %45 : vector<8x1xf32> to vector<8x8xf32>
    %47 = arith.mulf %42, %46 : vector<8x8xf32>
    %48 = arith.truncf %47 : vector<8x8xf32> to vector<8x8xbf16>
    %cst_13 = arith.constant dense<0.000000e+00> : vector<8x8xf32>
    %49 = tpu.matmul %48, %32, %cst_13 {dimension_numbers = #tpu.dot_dimension_numbers<[1], [0], [0], [1], [0, 0, 1, 1], [], []>} : vector<8x8xbf16>, vector<8x8xbf16>, vector<8x8xf32> -> vector<8x8xf32>
    %50 = vector.extract_strided_slice %1 {offsets = [0, 16], sizes = [8, 8], strides = [1, 1]} : vector<8x192xf32> to vector<8x8xf32>
    %51 = arith.truncf %50 : vector<8x8xf32> to vector<8x8xbf16>
    %52 = vector.extract_strided_slice %1 {offsets = [0, 80], sizes = [8, 8], strides = [1, 1]} : vector<8x192xf32> to vector<8x8xf32>
    %53 = arith.truncf %52 : vector<8x8xf32> to vector<8x8xbf16>
    %54 = vector.extract_strided_slice %1 {offsets = [0, 144], sizes = [8, 8], strides = [1, 1]} : vector<8x192xf32> to vector<8x8xf32>
    %55 = arith.truncf %54 : vector<8x8xf32> to vector<8x8xbf16>
    %cst_14 = arith.constant dense<0.000000e+00> : vector<8x8xf32>
    %56 = tpu.matmul %51, %53, %cst_14 {dimension_numbers = #tpu.dot_dimension_numbers<[1], [1], [0], [0], [0, 0, 1, 0], [], []>} : vector<8x8xbf16>, vector<8x8xbf16>, vector<8x8xf32> -> vector<8x8xf32>
    %cst_15 = arith.constant 0.353553385 : f32
    %57 = vector.broadcast %cst_15 : f32 to vector<8x8xf32>
    %58 = arith.mulf %56, %57 : vector<8x8xf32>
    %59 = vector.broadcast %3 : vector<1x8xf32> to vector<8x8xf32>
    %60 = arith.addf %58, %59 : vector<8x8xf32>
    %cst_16 = arith.constant dense<0xFF800000> : vector<8xf32>
    %61 = vector.multi_reduction <maximumf>, %60, %cst_16 [1] : vector<8x8xf32> to vector<8xf32>
    %62 = vector.shape_cast %61 : vector<8xf32> to vector<8x1xf32>
    %63 = vector.broadcast %62 : vector<8x1xf32> to vector<8x8xf32>
    %64 = arith.subf %60, %63 : vector<8x8xf32>
    %65 = math.exp %64 : vector<8x8xf32>
    %cst_17 = arith.constant dense<0.000000e+00> : vector<8xf32>
    %66 = vector.multi_reduction <add>, %65, %cst_17 [1] : vector<8x8xf32> to vector<8xf32>
    %67 = vector.shape_cast %66 : vector<8xf32> to vector<8x1xf32>
    %68 = tpu.reciprocal %67 {approx = true} : vector<8x1xf32> -> vector<8x1xf32>
    %69 = vector.broadcast %68 : vector<8x1xf32> to vector<8x8xf32>
    %70 = arith.mulf %65, %69 : vector<8x8xf32>
    %71 = arith.truncf %70 : vector<8x8xf32> to vector<8x8xbf16>
    %cst_18 = arith.constant dense<0.000000e+00> : vector<8x8xf32>
    %72 = tpu.matmul %71, %55, %cst_18 {dimension_numbers = #tpu.dot_dimension_numbers<[1], [0], [0], [1], [0, 0, 1, 1], [], []>} : vector<8x8xbf16>, vector<8x8xbf16>, vector<8x8xf32> -> vector<8x8xf32>
    %73 = vector.extract_strided_slice %1 {offsets = [0, 24], sizes = [8, 8], strides = [1, 1]} : vector<8x192xf32> to vector<8x8xf32>
    %74 = arith.truncf %73 : vector<8x8xf32> to vector<8x8xbf16>
    %75 = vector.extract_strided_slice %1 {offsets = [0, 88], sizes = [8, 8], strides = [1, 1]} : vector<8x192xf32> to vector<8x8xf32>
    %76 = arith.truncf %75 : vector<8x8xf32> to vector<8x8xbf16>
    %77 = vector.extract_strided_slice %1 {offsets = [0, 152], sizes = [8, 8], strides = [1, 1]} : vector<8x192xf32> to vector<8x8xf32>
    %78 = arith.truncf %77 : vector<8x8xf32> to vector<8x8xbf16>
    %cst_19 = arith.constant dense<0.000000e+00> : vector<8x8xf32>
    %79 = tpu.matmul %74, %76, %cst_19 {dimension_numbers = #tpu.dot_dimension_numbers<[1], [1], [0], [0], [0, 0, 1, 0], [], []>} : vector<8x8xbf16>, vector<8x8xbf16>, vector<8x8xf32> -> vector<8x8xf32>
    %cst_20 = arith.constant 0.353553385 : f32
    %80 = vector.broadcast %cst_20 : f32 to vector<8x8xf32>
    %81 = arith.mulf %79, %80 : vector<8x8xf32>
    %82 = vector.broadcast %3 : vector<1x8xf32> to vector<8x8xf32>
    %83 = arith.addf %81, %82 : vector<8x8xf32>
    %cst_21 = arith.constant dense<0xFF800000> : vector<8xf32>
    %84 = vector.multi_reduction <maximumf>, %83, %cst_21 [1] : vector<8x8xf32> to vector<8xf32>
    %85 = vector.shape_cast %84 : vector<8xf32> to vector<8x1xf32>
    %86 = vector.broadcast %85 : vector<8x1xf32> to vector<8x8xf32>
    %87 = arith.subf %83, %86 : vector<8x8xf32>
    %88 = math.exp %87 : vector<8x8xf32>
    %cst_22 = arith.constant dense<0.000000e+00> : vector<8xf32>
    %89 = vector.multi_reduction <add>, %88, %cst_22 [1] : vector<8x8xf32> to vector<8xf32>
    %90 = vector.shape_cast %89 : vector<8xf32> to vector<8x1xf32>
    %91 = tpu.reciprocal %90 {approx = true} : vector<8x1xf32> -> vector<8x1xf32>
    %92 = vector.broadcast %91 : vector<8x1xf32> to vector<8x8xf32>
    %93 = arith.mulf %88, %92 : vector<8x8xf32>
    %94 = arith.truncf %93 : vector<8x8xf32> to vector<8x8xbf16>
    %cst_23 = arith.constant dense<0.000000e+00> : vector<8x8xf32>
    %95 = tpu.matmul %94, %78, %cst_23 {dimension_numbers = #tpu.dot_dimension_numbers<[1], [0], [0], [1], [0, 0, 1, 1], [], []>} : vector<8x8xbf16>, vector<8x8xbf16>, vector<8x8xf32> -> vector<8x8xf32>
    %96 = vector.extract_strided_slice %1 {offsets = [0, 32], sizes = [8, 8], strides = [1, 1]} : vector<8x192xf32> to vector<8x8xf32>
    %97 = arith.truncf %96 : vector<8x8xf32> to vector<8x8xbf16>
    %98 = vector.extract_strided_slice %1 {offsets = [0, 96], sizes = [8, 8], strides = [1, 1]} : vector<8x192xf32> to vector<8x8xf32>
    %99 = arith.truncf %98 : vector<8x8xf32> to vector<8x8xbf16>
    %100 = vector.extract_strided_slice %1 {offsets = [0, 160], sizes = [8, 8], strides = [1, 1]} : vector<8x192xf32> to vector<8x8xf32>
    %101 = arith.truncf %100 : vector<8x8xf32> to vector<8x8xbf16>
    %cst_24 = arith.constant dense<0.000000e+00> : vector<8x8xf32>
    %102 = tpu.matmul %97, %99, %cst_24 {dimension_numbers = #tpu.dot_dimension_numbers<[1], [1], [0], [0], [0, 0, 1, 0], [], []>} : vector<8x8xbf16>, vector<8x8xbf16>, vector<8x8xf32> -> vector<8x8xf32>
    %cst_25 = arith.constant 0.353553385 : f32
    %103 = vector.broadcast %cst_25 : f32 to vector<8x8xf32>
    %104 = arith.mulf %102, %103 : vector<8x8xf32>
    %105 = vector.broadcast %3 : vector<1x8xf32> to vector<8x8xf32>
    %106 = arith.addf %104, %105 : vector<8x8xf32>
    %cst_26 = arith.constant dense<0xFF800000> : vector<8xf32>
    %107 = vector.multi_reduction <maximumf>, %106, %cst_26 [1] : vector<8x8xf32> to vector<8xf32>
    %108 = vector.shape_cast %107 : vector<8xf32> to vector<8x1xf32>
    %109 = vector.broadcast %108 : vector<8x1xf32> to vector<8x8xf32>
    %110 = arith.subf %106, %109 : vector<8x8xf32>
    %111 = math.exp %110 : vector<8x8xf32>
    %cst_27 = arith.constant dense<0.000000e+00> : vector<8xf32>
    %112 = vector.multi_reduction <add>, %111, %cst_27 [1] : vector<8x8xf32> to vector<8xf32>
    %113 = vector.shape_cast %112 : vector<8xf32> to vector<8x1xf32>
    %114 = tpu.reciprocal %113 {approx = true} : vector<8x1xf32> -> vector<8x1xf32>
    %115 = vector.broadcast %114 : vector<8x1xf32> to vector<8x8xf32>
    %116 = arith.mulf %111, %115 : vector<8x8xf32>
    %117 = arith.truncf %116 : vector<8x8xf32> to vector<8x8xbf16>
    %cst_28 = arith.constant dense<0.000000e+00> : vector<8x8xf32>
    %118 = tpu.matmul %117, %101, %cst_28 {dimension_numbers = #tpu.dot_dimension_numbers<[1], [0], [0], [1], [0, 0, 1, 1], [], []>} : vector<8x8xbf16>, vector<8x8xbf16>, vector<8x8xf32> -> vector<8x8xf32>
    %119 = vector.extract_strided_slice %1 {offsets = [0, 40], sizes = [8, 8], strides = [1, 1]} : vector<8x192xf32> to vector<8x8xf32>
    %120 = arith.truncf %119 : vector<8x8xf32> to vector<8x8xbf16>
    %121 = vector.extract_strided_slice %1 {offsets = [0, 104], sizes = [8, 8], strides = [1, 1]} : vector<8x192xf32> to vector<8x8xf32>
    %122 = arith.truncf %121 : vector<8x8xf32> to vector<8x8xbf16>
    %123 = vector.extract_strided_slice %1 {offsets = [0, 168], sizes = [8, 8], strides = [1, 1]} : vector<8x192xf32> to vector<8x8xf32>
    %124 = arith.truncf %123 : vector<8x8xf32> to vector<8x8xbf16>
    %cst_29 = arith.constant dense<0.000000e+00> : vector<8x8xf32>
    %125 = tpu.matmul %120, %122, %cst_29 {dimension_numbers = #tpu.dot_dimension_numbers<[1], [1], [0], [0], [0, 0, 1, 0], [], []>} : vector<8x8xbf16>, vector<8x8xbf16>, vector<8x8xf32> -> vector<8x8xf32>
    %cst_30 = arith.constant 0.353553385 : f32
    %126 = vector.broadcast %cst_30 : f32 to vector<8x8xf32>
    %127 = arith.mulf %125, %126 : vector<8x8xf32>
    %128 = vector.broadcast %3 : vector<1x8xf32> to vector<8x8xf32>
    %129 = arith.addf %127, %128 : vector<8x8xf32>
    %cst_31 = arith.constant dense<0xFF800000> : vector<8xf32>
    %130 = vector.multi_reduction <maximumf>, %129, %cst_31 [1] : vector<8x8xf32> to vector<8xf32>
    %131 = vector.shape_cast %130 : vector<8xf32> to vector<8x1xf32>
    %132 = vector.broadcast %131 : vector<8x1xf32> to vector<8x8xf32>
    %133 = arith.subf %129, %132 : vector<8x8xf32>
    %134 = math.exp %133 : vector<8x8xf32>
    %cst_32 = arith.constant dense<0.000000e+00> : vector<8xf32>
    %135 = vector.multi_reduction <add>, %134, %cst_32 [1] : vector<8x8xf32> to vector<8xf32>
    %136 = vector.shape_cast %135 : vector<8xf32> to vector<8x1xf32>
    %137 = tpu.reciprocal %136 {approx = true} : vector<8x1xf32> -> vector<8x1xf32>
    %138 = vector.broadcast %137 : vector<8x1xf32> to vector<8x8xf32>
    %139 = arith.mulf %134, %138 : vector<8x8xf32>
    %140 = arith.truncf %139 : vector<8x8xf32> to vector<8x8xbf16>
    %cst_33 = arith.constant dense<0.000000e+00> : vector<8x8xf32>
    %141 = tpu.matmul %140, %124, %cst_33 {dimension_numbers = #tpu.dot_dimension_numbers<[1], [0], [0], [1], [0, 0, 1, 1], [], []>} : vector<8x8xbf16>, vector<8x8xbf16>, vector<8x8xf32> -> vector<8x8xf32>
    %142 = vector.extract_strided_slice %1 {offsets = [0, 48], sizes = [8, 8], strides = [1, 1]} : vector<8x192xf32> to vector<8x8xf32>
    %143 = arith.truncf %142 : vector<8x8xf32> to vector<8x8xbf16>
    %144 = vector.extract_strided_slice %1 {offsets = [0, 112], sizes = [8, 8], strides = [1, 1]} : vector<8x192xf32> to vector<8x8xf32>
    %145 = arith.truncf %144 : vector<8x8xf32> to vector<8x8xbf16>
    %146 = vector.extract_strided_slice %1 {offsets = [0, 176], sizes = [8, 8], strides = [1, 1]} : vector<8x192xf32> to vector<8x8xf32>
    %147 = arith.truncf %146 : vector<8x8xf32> to vector<8x8xbf16>
    %cst_34 = arith.constant dense<0.000000e+00> : vector<8x8xf32>
    %148 = tpu.matmul %143, %145, %cst_34 {dimension_numbers = #tpu.dot_dimension_numbers<[1], [1], [0], [0], [0, 0, 1, 0], [], []>} : vector<8x8xbf16>, vector<8x8xbf16>, vector<8x8xf32> -> vector<8x8xf32>
    %cst_35 = arith.constant 0.353553385 : f32
    %149 = vector.broadcast %cst_35 : f32 to vector<8x8xf32>
    %150 = arith.mulf %148, %149 : vector<8x8xf32>
    %151 = vector.broadcast %3 : vector<1x8xf32> to vector<8x8xf32>
    %152 = arith.addf %150, %151 : vector<8x8xf32>
    %cst_36 = arith.constant dense<0xFF800000> : vector<8xf32>
    %153 = vector.multi_reduction <maximumf>, %152, %cst_36 [1] : vector<8x8xf32> to vector<8xf32>
    %154 = vector.shape_cast %153 : vector<8xf32> to vector<8x1xf32>
    %155 = vector.broadcast %154 : vector<8x1xf32> to vector<8x8xf32>
    %156 = arith.subf %152, %155 : vector<8x8xf32>
    %157 = math.exp %156 : vector<8x8xf32>
    %cst_37 = arith.constant dense<0.000000e+00> : vector<8xf32>
    %158 = vector.multi_reduction <add>, %157, %cst_37 [1] : vector<8x8xf32> to vector<8xf32>
    %159 = vector.shape_cast %158 : vector<8xf32> to vector<8x1xf32>
    %160 = tpu.reciprocal %159 {approx = true} : vector<8x1xf32> -> vector<8x1xf32>
    %161 = vector.broadcast %160 : vector<8x1xf32> to vector<8x8xf32>
    %162 = arith.mulf %157, %161 : vector<8x8xf32>
    %163 = arith.truncf %162 : vector<8x8xf32> to vector<8x8xbf16>
    %cst_38 = arith.constant dense<0.000000e+00> : vector<8x8xf32>
    %164 = tpu.matmul %163, %147, %cst_38 {dimension_numbers = #tpu.dot_dimension_numbers<[1], [0], [0], [1], [0, 0, 1, 1], [], []>} : vector<8x8xbf16>, vector<8x8xbf16>, vector<8x8xf32> -> vector<8x8xf32>
    %165 = vector.extract_strided_slice %1 {offsets = [0, 56], sizes = [8, 8], strides = [1, 1]} : vector<8x192xf32> to vector<8x8xf32>
    %166 = arith.truncf %165 : vector<8x8xf32> to vector<8x8xbf16>
    %167 = vector.extract_strided_slice %1 {offsets = [0, 120], sizes = [8, 8], strides = [1, 1]} : vector<8x192xf32> to vector<8x8xf32>
    %168 = arith.truncf %167 : vector<8x8xf32> to vector<8x8xbf16>
    %169 = vector.extract_strided_slice %1 {offsets = [0, 184], sizes = [8, 8], strides = [1, 1]} : vector<8x192xf32> to vector<8x8xf32>
    %170 = arith.truncf %169 : vector<8x8xf32> to vector<8x8xbf16>
    %cst_39 = arith.constant dense<0.000000e+00> : vector<8x8xf32>
    %171 = tpu.matmul %166, %168, %cst_39 {dimension_numbers = #tpu.dot_dimension_numbers<[1], [1], [0], [0], [0, 0, 1, 0], [], []>} : vector<8x8xbf16>, vector<8x8xbf16>, vector<8x8xf32> -> vector<8x8xf32>
    %cst_40 = arith.constant 0.353553385 : f32
    %172 = vector.broadcast %cst_40 : f32 to vector<8x8xf32>
    %173 = arith.mulf %171, %172 : vector<8x8xf32>
    %174 = vector.broadcast %3 : vector<1x8xf32> to vector<8x8xf32>
    %175 = arith.addf %173, %174 : vector<8x8xf32>
    %cst_41 = arith.constant dense<0xFF800000> : vector<8xf32>
    %176 = vector.multi_reduction <maximumf>, %175, %cst_41 [1] : vector<8x8xf32> to vector<8xf32>
    %177 = vector.shape_cast %176 : vector<8xf32> to vector<8x1xf32>
    %178 = vector.broadcast %177 : vector<8x1xf32> to vector<8x8xf32>
    %179 = arith.subf %175, %178 : vector<8x8xf32>
    %180 = math.exp %179 : vector<8x8xf32>
    %cst_42 = arith.constant dense<0.000000e+00> : vector<8xf32>
    %181 = vector.multi_reduction <add>, %180, %cst_42 [1] : vector<8x8xf32> to vector<8xf32>
    %182 = vector.shape_cast %181 : vector<8xf32> to vector<8x1xf32>
    %183 = tpu.reciprocal %182 {approx = true} : vector<8x1xf32> -> vector<8x1xf32>
    %184 = vector.broadcast %183 : vector<8x1xf32> to vector<8x8xf32>
    %185 = arith.mulf %180, %184 : vector<8x8xf32>
    %186 = arith.truncf %185 : vector<8x8xf32> to vector<8x8xbf16>
    %cst_43 = arith.constant dense<0.000000e+00> : vector<8x8xf32>
    %187 = tpu.matmul %186, %170, %cst_43 {dimension_numbers = #tpu.dot_dimension_numbers<[1], [0], [0], [1], [0, 0, 1, 1], [], []>} : vector<8x8xbf16>, vector<8x8xbf16>, vector<8x8xf32> -> vector<8x8xf32>
    %188 = tpu.concatenate %26, %49, %72, %95, %118, %141, %164, %187 in 1 : vector<8x8xf32>, vector<8x8xf32>, vector<8x8xf32>, vector<8x8xf32>, vector<8x8xf32>, vector<8x8xf32>, vector<8x8xf32>, vector<8x8xf32> -> vector<8x64xf32>
    %c0_44 = arith.constant 0 : index
    %c0_45 = arith.constant 0 : index
    %c0_46 = arith.constant 0 : index
    %189 = vector.load %arg3[%c0_44, %c0_45, %c0_46] : memref<1x8x64xf32, #tpu.memory_space<vmem>>, vector<1x8x64xf32>
    %190 = vector.shape_cast %189 : vector<1x8x64xf32> to vector<8x64xf32>
    %191 = vector.shape_cast %188 : vector<8x64xf32> to vector<1x8x64xf32>
    tpu.vector_store %arg3[%c0_44, %c0_45, %c0_46], %191 {strides = array<i32>} : memref<1x8x64xf32, #tpu.memory_space<vmem>>, vector<1x8x64xf32>,
    return
  }
  func.func @transform_0(%arg0: i32) -> (i32, i32, i32) {
    %c0_i32 = arith.constant 0 : i32
    %c0_i32_0 = arith.constant 0 : i32
    %c0_i32_1 = arith.constant 0 : i32
    return %arg0, %c0_i32, %c0_i32_0 : i32, i32, i32
  }
  func.func @transform_1(%arg0: i32) -> (i32, i32, i32) {
    %c0_i32 = arith.constant 0 : i32
    %c0_i32_0 = arith.constant 0 : i32
    %c0_i32_1 = arith.constant 0 : i32
    return %arg0, %c0_i32, %c0_i32_0 : i32, i32, i32
  }
  func.func @transform_2(%arg0: i32) -> (i32, i32, i32) {
    %c0_i32 = arith.constant 0 : i32
    %c0_i32_0 = arith.constant 0 : i32
    %c0_i32_1 = arith.constant 0 : i32
    return %arg0, %c0_i32, %c0_i32_0 : i32, i32, i32
  }
}

module attributes {stable_mosaic.version = 11 : i64} {
  func.func @_linear_residual_kernel(%arg0: i32, %arg1: memref<16x64xf32, #tpu.memory_space<vmem>>, %arg2: memref<64x64xbf16, #tpu.memory_space<vmem>>, %arg3: memref<1x64xf32, #tpu.memory_space<vmem>>, %arg4: memref<16x64xf32, #tpu.memory_space<vmem>>, %arg5: memref<16x64xf32, #tpu.memory_space<vmem>>) attributes {dimension_semantics = [#tpu.dimension_semantics<parallel>], iteration_bounds = array<i64: 1>, scalar_prefetch = 0 : i64, scratch_operands = 0 : i64, tpu.core_type = #tpu.core_type<tc>, window_params = [{transform_indices = @transform_0, window_bounds = array<i64: 16, 64>}, {pipeline_mode = #tpu.pipeline_mode<synchronous>, transform_indices = @transform_1, window_bounds = array<i64: 64, 64>}, {pipeline_mode = #tpu.pipeline_mode<synchronous>, transform_indices = @transform_2, window_bounds = array<i64: 1, 64>}, {transform_indices = @transform_3, window_bounds = array<i64: 16, 64>}, {transform_indices = @transform_4, window_bounds = array<i64: 16, 64>}]} {
    %c0 = arith.constant 0 : index
    %c0_0 = arith.constant 0 : index
    %0 = vector.load %arg1[%c0, %c0_0] : memref<16x64xf32, #tpu.memory_space<vmem>>, vector<16x64xf32>
    %1 = arith.truncf %0 : vector<16x64xf32> to vector<16x64xbf16>
    %c0_1 = arith.constant 0 : index
    %c0_2 = arith.constant 0 : index
    %2 = vector.load %arg2[%c0_1, %c0_2] : memref<64x64xbf16, #tpu.memory_space<vmem>>, vector<64x64xbf16>
    %cst = arith.constant dense<0.000000e+00> : vector<16x64xf32>
    %3 = tpu.matmul %1, %2, %cst {dimension_numbers = #tpu.dot_dimension_numbers<[1], [0], [0], [1], [0, 0, 1, 1], [], []>} : vector<16x64xbf16>, vector<64x64xbf16>, vector<16x64xf32> -> vector<16x64xf32>
    %c0_3 = arith.constant 0 : index
    %c0_4 = arith.constant 0 : index
    %4 = vector.load %arg4[%c0_3, %c0_4] : memref<16x64xf32, #tpu.memory_space<vmem>>, vector<16x64xf32>
    %5 = arith.addf %4, %3 : vector<16x64xf32>
    %c0_5 = arith.constant 0 : index
    %c0_6 = arith.constant 0 : index
    %6 = vector.load %arg3[%c0_5, %c0_6] : memref<1x64xf32, #tpu.memory_space<vmem>>, vector<1x64xf32>
    %7 = vector.broadcast %6 : vector<1x64xf32> to vector<16x64xf32>
    %8 = arith.addf %5, %7 : vector<16x64xf32>
    %c0_7 = arith.constant 0 : index
    %c0_8 = arith.constant 0 : index
    %9 = vector.load %arg5[%c0_7, %c0_8] : memref<16x64xf32, #tpu.memory_space<vmem>>, vector<16x64xf32>
    tpu.vector_store %arg5[%c0_7, %c0_8], %8 {strides = array<i32>} : memref<16x64xf32, #tpu.memory_space<vmem>>, vector<16x64xf32>,
    return
  }
  func.func @transform_0(%arg0: i32) -> (i32, i32) {
    %c0_i32 = arith.constant 0 : i32
    %c0_i32_0 = arith.constant 0 : i32
    return %arg0, %c0_i32 : i32, i32
  }
  func.func @transform_1(%arg0: i32) -> (i32, i32) {
    %c0_i32 = arith.constant 0 : i32
    %c0_i32_0 = arith.constant 0 : i32
    %c0_i32_1 = arith.constant 0 : i32
    return %c0_i32, %c0_i32_0 : i32, i32
  }
  func.func @transform_2(%arg0: i32) -> (i32, i32) {
    %c0_i32 = arith.constant 0 : i32
    %c0_i32_0 = arith.constant 0 : i32
    %c0_i32_1 = arith.constant 0 : i32
    return %c0_i32, %c0_i32_0 : i32, i32
  }
  func.func @transform_3(%arg0: i32) -> (i32, i32) {
    %c0_i32 = arith.constant 0 : i32
    %c0_i32_0 = arith.constant 0 : i32
    return %arg0, %c0_i32 : i32, i32
  }
  func.func @transform_4(%arg0: i32) -> (i32, i32) {
    %c0_i32 = arith.constant 0 : i32
    %c0_i32_0 = arith.constant 0 : i32
    return %arg0, %c0_i32 : i32, i32
  }
}

module attributes {stable_mosaic.version = 11 : i64} {
  func.func @_ln_ffn_residual_kernel(%arg0: i32, %arg1: memref<16x64xf32, #tpu.memory_space<vmem>>, %arg2: memref<1x64xf32, #tpu.memory_space<vmem>>, %arg3: memref<1x64xf32, #tpu.memory_space<vmem>>, %arg4: memref<64x128xbf16, #tpu.memory_space<vmem>>, %arg5: memref<1x128xf32, #tpu.memory_space<vmem>>, %arg6: memref<128x64xbf16, #tpu.memory_space<vmem>>, %arg7: memref<1x64xf32, #tpu.memory_space<vmem>>, %arg8: memref<16x64xf32, #tpu.memory_space<vmem>>) attributes {dimension_semantics = [#tpu.dimension_semantics<parallel>], iteration_bounds = array<i64: 1>, scalar_prefetch = 0 : i64, scratch_operands = 0 : i64, tpu.core_type = #tpu.core_type<tc>, window_params = [{transform_indices = @transform_0, window_bounds = array<i64: 16, 64>}, {pipeline_mode = #tpu.pipeline_mode<synchronous>, transform_indices = @transform_1, window_bounds = array<i64: 1, 64>}, {pipeline_mode = #tpu.pipeline_mode<synchronous>, transform_indices = @transform_2, window_bounds = array<i64: 1, 64>}, {pipeline_mode = #tpu.pipeline_mode<synchronous>, transform_indices = @transform_3, window_bounds = array<i64: 64, 128>}, {pipeline_mode = #tpu.pipeline_mode<synchronous>, transform_indices = @transform_4, window_bounds = array<i64: 1, 128>}, {pipeline_mode = #tpu.pipeline_mode<synchronous>, transform_indices = @transform_5, window_bounds = array<i64: 128, 64>}, {pipeline_mode = #tpu.pipeline_mode<synchronous>, transform_indices = @transform_6, window_bounds = array<i64: 1, 64>}, {transform_indices = @transform_7, window_bounds = array<i64: 16, 64>}]} {
    %c0 = arith.constant 0 : index
    %c0_0 = arith.constant 0 : index
    %0 = vector.load %arg1[%c0, %c0_0] : memref<16x64xf32, #tpu.memory_space<vmem>>, vector<16x64xf32>
    %c0_1 = arith.constant 0 : index
    %c0_2 = arith.constant 0 : index
    %1 = vector.load %arg2[%c0_1, %c0_2] : memref<1x64xf32, #tpu.memory_space<vmem>>, vector<1x64xf32>
    %c0_3 = arith.constant 0 : index
    %c0_4 = arith.constant 0 : index
    %2 = vector.load %arg3[%c0_3, %c0_4] : memref<1x64xf32, #tpu.memory_space<vmem>>, vector<1x64xf32>
    %cst = arith.constant dense<0.000000e+00> : vector<16xf32>
    %3 = vector.multi_reduction <add>, %0, %cst [1] : vector<16x64xf32> to vector<16xf32>
    %4 = vector.shape_cast %3 : vector<16xf32> to vector<16x1xf32>
    %cst_5 = arith.constant 6.400000e+01 : f32
    %5 = vector.broadcast %cst_5 : f32 to vector<16x1xf32>
    %6 = arith.divf %4, %5 : vector<16x1xf32>
    %7 = vector.broadcast %6 : vector<16x1xf32> to vector<16x64xf32>
    %8 = arith.subf %0, %7 : vector<16x64xf32>
    %9 = arith.mulf %8, %8 : vector<16x64xf32>
    %cst_6 = arith.constant dense<0.000000e+00> : vector<16xf32>
    %10 = vector.multi_reduction <add>, %9, %cst_6 [1] : vector<16x64xf32> to vector<16xf32>
    %11 = vector.shape_cast %10 : vector<16xf32> to vector<16x1xf32>
    %cst_7 = arith.constant 0.0158730168 : f32
    %12 = vector.broadcast %cst_7 : f32 to vector<16x1xf32>
    %13 = arith.mulf %11, %12 : vector<16x1xf32>
    %14 = math.sqrt %13 : vector<16x1xf32>
    %cst_8 = arith.constant 9.99999997E-7 : f32
    %15 = vector.broadcast %cst_8 : f32 to vector<16x1xf32>
    %16 = arith.addf %14, %15 : vector<16x1xf32>
    %17 = tpu.reciprocal %16 {approx = true} : vector<16x1xf32> -> vector<16x1xf32>
    %18 = vector.broadcast %6 : vector<16x1xf32> to vector<16x64xf32>
    %19 = arith.subf %0, %18 : vector<16x64xf32>
    %20 = vector.broadcast %1 : vector<1x64xf32> to vector<16x64xf32>
    %21 = arith.mulf %20, %19 : vector<16x64xf32>
    %22 = vector.broadcast %17 : vector<16x1xf32> to vector<16x64xf32>
    %23 = arith.mulf %21, %22 : vector<16x64xf32>
    %24 = vector.broadcast %2 : vector<1x64xf32> to vector<16x64xf32>
    %25 = arith.addf %23, %24 : vector<16x64xf32>
    %26 = arith.truncf %25 : vector<16x64xf32> to vector<16x64xbf16>
    %c0_9 = arith.constant 0 : index
    %c0_10 = arith.constant 0 : index
    %27 = vector.load %arg4[%c0_9, %c0_10] : memref<64x128xbf16, #tpu.memory_space<vmem>>, vector<64x128xbf16>
    %cst_11 = arith.constant dense<0.000000e+00> : vector<16x128xf32>
    %28 = tpu.matmul %26, %27, %cst_11 {dimension_numbers = #tpu.dot_dimension_numbers<[1], [0], [0], [1], [0, 0, 1, 1], [], []>} : vector<16x64xbf16>, vector<64x128xbf16>, vector<16x128xf32> -> vector<16x128xf32>
    %c0_12 = arith.constant 0 : index
    %c0_13 = arith.constant 0 : index
    %29 = vector.load %arg5[%c0_12, %c0_13] : memref<1x128xf32, #tpu.memory_space<vmem>>, vector<1x128xf32>
    %30 = vector.broadcast %29 : vector<1x128xf32> to vector<16x128xf32>
    %31 = arith.addf %28, %30 : vector<16x128xf32>
    %cst_14 = arith.constant 0.000000e+00 : f32
    %32 = vector.broadcast %cst_14 : f32 to vector<16x128xf32>
    %33 = arith.maximumf %31, %32 : vector<16x128xf32>
    %34 = arith.truncf %33 : vector<16x128xf32> to vector<16x128xbf16>
    %c0_15 = arith.constant 0 : index
    %c0_16 = arith.constant 0 : index
    %35 = vector.load %arg6[%c0_15, %c0_16] : memref<128x64xbf16, #tpu.memory_space<vmem>>, vector<128x64xbf16>
    %cst_17 = arith.constant dense<0.000000e+00> : vector<16x64xf32>
    %36 = tpu.matmul %34, %35, %cst_17 {dimension_numbers = #tpu.dot_dimension_numbers<[1], [0], [0], [1], [0, 0, 1, 1], [], []>} : vector<16x128xbf16>, vector<128x64xbf16>, vector<16x64xf32> -> vector<16x64xf32>
    %c0_18 = arith.constant 0 : index
    %c0_19 = arith.constant 0 : index
    %37 = vector.load %arg7[%c0_18, %c0_19] : memref<1x64xf32, #tpu.memory_space<vmem>>, vector<1x64xf32>
    %38 = vector.broadcast %37 : vector<1x64xf32> to vector<16x64xf32>
    %39 = arith.addf %36, %38 : vector<16x64xf32>
    %40 = arith.addf %0, %39 : vector<16x64xf32>
    %c0_20 = arith.constant 0 : index
    %c0_21 = arith.constant 0 : index
    %41 = vector.load %arg8[%c0_20, %c0_21] : memref<16x64xf32, #tpu.memory_space<vmem>>, vector<16x64xf32>
    tpu.vector_store %arg8[%c0_20, %c0_21], %40 {strides = array<i32>} : memref<16x64xf32, #tpu.memory_space<vmem>>, vector<16x64xf32>,
    return
  }
  func.func @transform_0(%arg0: i32) -> (i32, i32) {
    %c0_i32 = arith.constant 0 : i32
    %c0_i32_0 = arith.constant 0 : i32
    return %arg0, %c0_i32 : i32, i32
  }
  func.func @transform_1(%arg0: i32) -> (i32, i32) {
    %c0_i32 = arith.constant 0 : i32
    %c0_i32_0 = arith.constant 0 : i32
    %c0_i32_1 = arith.constant 0 : i32
    return %c0_i32, %c0_i32_0 : i32, i32
  }
  func.func @transform_2(%arg0: i32) -> (i32, i32) {
    %c0_i32 = arith.constant 0 : i32
    %c0_i32_0 = arith.constant 0 : i32
    %c0_i32_1 = arith.constant 0 : i32
    return %c0_i32, %c0_i32_0 : i32, i32
  }
  func.func @transform_3(%arg0: i32) -> (i32, i32) {
    %c0_i32 = arith.constant 0 : i32
    %c0_i32_0 = arith.constant 0 : i32
    %c0_i32_1 = arith.constant 0 : i32
    return %c0_i32, %c0_i32_0 : i32, i32
  }
  func.func @transform_4(%arg0: i32) -> (i32, i32) {
    %c0_i32 = arith.constant 0 : i32
    %c0_i32_0 = arith.constant 0 : i32
    %c0_i32_1 = arith.constant 0 : i32
    return %c0_i32, %c0_i32_0 : i32, i32
  }
  func.func @transform_5(%arg0: i32) -> (i32, i32) {
    %c0_i32 = arith.constant 0 : i32
    %c0_i32_0 = arith.constant 0 : i32
    %c0_i32_1 = arith.constant 0 : i32
    return %c0_i32, %c0_i32_0 : i32, i32
  }
  func.func @transform_6(%arg0: i32) -> (i32, i32) {
    %c0_i32 = arith.constant 0 : i32
    %c0_i32_0 = arith.constant 0 : i32
    %c0_i32_1 = arith.constant 0 : i32
    return %c0_i32, %c0_i32_0 : i32, i32
  }
  func.func @transform_7(%arg0: i32) -> (i32, i32) {
    %c0_i32 = arith.constant 0 : i32
    %c0_i32_0 = arith.constant 0 : i32
    return %arg0, %c0_i32 : i32, i32
  }
}

module attributes {stable_mosaic.version = 11 : i64} {
  func.func @_layernorm_kernel(%arg0: i32, %arg1: memref<16x64xf32, #tpu.memory_space<vmem>>, %arg2: memref<1x64xf32, #tpu.memory_space<vmem>>, %arg3: memref<1x64xf32, #tpu.memory_space<vmem>>, %arg4: memref<16x64xf32, #tpu.memory_space<vmem>>) attributes {dimension_semantics = [#tpu.dimension_semantics<parallel>], iteration_bounds = array<i64: 1>, scalar_prefetch = 0 : i64, scratch_operands = 0 : i64, tpu.core_type = #tpu.core_type<tc>, window_params = [{transform_indices = @transform_0, window_bounds = array<i64: 16, 64>}, {pipeline_mode = #tpu.pipeline_mode<synchronous>, transform_indices = @transform_1, window_bounds = array<i64: 1, 64>}, {pipeline_mode = #tpu.pipeline_mode<synchronous>, transform_indices = @transform_2, window_bounds = array<i64: 1, 64>}, {transform_indices = @transform_3, window_bounds = array<i64: 16, 64>}]} {
    %c0 = arith.constant 0 : index
    %c0_0 = arith.constant 0 : index
    %0 = vector.load %arg1[%c0, %c0_0] : memref<16x64xf32, #tpu.memory_space<vmem>>, vector<16x64xf32>
    %c0_1 = arith.constant 0 : index
    %c0_2 = arith.constant 0 : index
    %1 = vector.load %arg2[%c0_1, %c0_2] : memref<1x64xf32, #tpu.memory_space<vmem>>, vector<1x64xf32>
    %c0_3 = arith.constant 0 : index
    %c0_4 = arith.constant 0 : index
    %2 = vector.load %arg3[%c0_3, %c0_4] : memref<1x64xf32, #tpu.memory_space<vmem>>, vector<1x64xf32>
    %cst = arith.constant dense<0.000000e+00> : vector<16xf32>
    %3 = vector.multi_reduction <add>, %0, %cst [1] : vector<16x64xf32> to vector<16xf32>
    %4 = vector.shape_cast %3 : vector<16xf32> to vector<16x1xf32>
    %cst_5 = arith.constant 6.400000e+01 : f32
    %5 = vector.broadcast %cst_5 : f32 to vector<16x1xf32>
    %6 = arith.divf %4, %5 : vector<16x1xf32>
    %7 = vector.broadcast %6 : vector<16x1xf32> to vector<16x64xf32>
    %8 = arith.subf %0, %7 : vector<16x64xf32>
    %9 = arith.mulf %8, %8 : vector<16x64xf32>
    %cst_6 = arith.constant dense<0.000000e+00> : vector<16xf32>
    %10 = vector.multi_reduction <add>, %9, %cst_6 [1] : vector<16x64xf32> to vector<16xf32>
    %11 = vector.shape_cast %10 : vector<16xf32> to vector<16x1xf32>
    %cst_7 = arith.constant 0.0158730168 : f32
    %12 = vector.broadcast %cst_7 : f32 to vector<16x1xf32>
    %13 = arith.mulf %11, %12 : vector<16x1xf32>
    %14 = math.sqrt %13 : vector<16x1xf32>
    %cst_8 = arith.constant 9.99999997E-7 : f32
    %15 = vector.broadcast %cst_8 : f32 to vector<16x1xf32>
    %16 = arith.addf %14, %15 : vector<16x1xf32>
    %17 = tpu.reciprocal %16 {approx = true} : vector<16x1xf32> -> vector<16x1xf32>
    %18 = vector.broadcast %6 : vector<16x1xf32> to vector<16x64xf32>
    %19 = arith.subf %0, %18 : vector<16x64xf32>
    %20 = vector.broadcast %1 : vector<1x64xf32> to vector<16x64xf32>
    %21 = arith.mulf %20, %19 : vector<16x64xf32>
    %22 = vector.broadcast %17 : vector<16x1xf32> to vector<16x64xf32>
    %23 = arith.mulf %21, %22 : vector<16x64xf32>
    %24 = vector.broadcast %2 : vector<1x64xf32> to vector<16x64xf32>
    %25 = arith.addf %23, %24 : vector<16x64xf32>
    %c0_9 = arith.constant 0 : index
    %c0_10 = arith.constant 0 : index
    %26 = vector.load %arg4[%c0_9, %c0_10] : memref<16x64xf32, #tpu.memory_space<vmem>>, vector<16x64xf32>
    tpu.vector_store %arg4[%c0_9, %c0_10], %25 {strides = array<i32>} : memref<16x64xf32, #tpu.memory_space<vmem>>, vector<16x64xf32>,
    return
  }
  func.func @transform_0(%arg0: i32) -> (i32, i32) {
    %c0_i32 = arith.constant 0 : i32
    %c0_i32_0 = arith.constant 0 : i32
    return %arg0, %c0_i32 : i32, i32
  }
  func.func @transform_1(%arg0: i32) -> (i32, i32) {
    %c0_i32 = arith.constant 0 : i32
    %c0_i32_0 = arith.constant 0 : i32
    %c0_i32_1 = arith.constant 0 : i32
    return %c0_i32, %c0_i32_0 : i32, i32
  }
  func.func @transform_2(%arg0: i32) -> (i32, i32) {
    %c0_i32 = arith.constant 0 : i32
    %c0_i32_0 = arith.constant 0 : i32
    %c0_i32_1 = arith.constant 0 : i32
    return %c0_i32, %c0_i32_0 : i32, i32
  }
  func.func @transform_3(%arg0: i32) -> (i32, i32) {
    %c0_i32 = arith.constant 0 : i32
    %c0_i32_0 = arith.constant 0 : i32
    return %arg0, %c0_i32 : i32, i32
  }
}

</mosaic_0001>

<bundles_post_ra>
// kernel: transformer_encoder_forward.9
= control target key start
LH: loop header
LB: loop body
LE: loop exit
PB: predicated region body
PF: predicated region fallthrough
CT: control target
= control target key end

     0   :  { %vm25_vm0 = vcmask 523264   ;;  %v230_v17 = vmov 0   ;;  %v94_v50 = vlaneseq  ;;  %s319_s0 = inlined_call_operand.vmem [shape: f32[16,64], index: 0, kind: input, shape index: {}]   ;;  %s320_s3 = inlined_call_operand.vmem [shape: bf16[64,192], index: 3, kind: input, shape index: {}]   ;;  %s321_s1 = inlined_call_operand.vmem [shape: f32[1,64], index: 1, kind: input, shape index: {}]   ;;  %s322_s2 = inlined_call_operand.vmem [shape: f32[1,64], index: 2, kind: input, shape index: {}]   ;;  %s323_s4 = inlined_call_operand.vmem [shape: f32[1,192], index: 4, kind: input, shape index: {}]   ;;  %s324_s5 = inlined_call_operand.vmem [shape: f32[16,192], index: 5, kind: output, shape index: {}]  }
   0x1   :  { %v21_v0 = vld [vmem:[%s319_s0] sm:$0xff]  ;;  %v22_v1 = vld [vmem:[%s319_s0 + $0x8] sm:$0xff]  ;;  %v213_v16 = vld [vmem:[%s320_s3 + $0x14] ss:$8 sps:$4 sm:$0xff]   ;;  %179 = vmatprep.mubr.bf16.mxu0 %v230_v17 }
   0x2   :  { %v26_v2 = vsel %vm25_vm0, %v21_v0, 0.0  ;;  %v29_v3 = vsel %vm25_vm0, %v22_v1, 0.0  ;;  %v210_v14 = vld [vmem:[%s320_s3 + $0x4] ss:$8 sps:$4 sm:$0xff]   ;;  %v212_v15 = vld [vmem:[%s320_s3] ss:$8 sps:$4 sm:$0xff]  }
   0x3   :  { %27 = vadd.xlane.f32.xlu0 %v26_v2  ;;  %147 = vmatprep.subr.bf16.mxu0 %v210_v14  ;;  %v215_v18 = vld [vmem:[%s320_s3 + $0x10] ss:$8 sps:$4 sm:$0xff]   ;;  %v216_v19 = vld [vmem:[%s320_s3 + $0x24] ss:$8 sps:$4 sm:$0xff]   ;;  %v218_v20 = vld [vmem:[%s320_s3 + $0x20] ss:$8 sps:$4 sm:$0xff]  }
   0x4   :  { %148 = vmatpush1.bf16.msra.mxu0 %v212_v15  ;;  %v219_v21 = vld [vmem:[%s320_s3 + $0x34] ss:$8 sps:$4 sm:$0xff]   ;;  %v221_v22 = vld [vmem:[%s320_s3 + $0x30] ss:$8 sps:$4 sm:$0xff]   ;;  %v198_v39 = vld [vmem:[%s321_s1] ss:$0 sm:$0xff] }
   0x5   :  { %149 = vmatprep.subr.bf16.mxu0 %v213_v16  ;;  %v199_v45 = vld [vmem:[%s322_s2] ss:$0 sm:$0xff]  ;;  %v95_v51 = vshrl.u32 %v94_v50, 7 }
   0x6   :  { %v92_v53 = vld [vmem:[%s323_s4] sm:$0x3] }
   0x7   :  { %30 = vadd.xlane.f32.xlu0 %v29_v3  ;;  %v96_v52 = vsub.s32 0, %v95_v51  ;;  %v100_v54 = vsub.s32 1, %v95_v51 }
   0x8   :  { %150 = vmatpush1.bf16.msra.mxu0 %v215_v18 }
   0x9   :  { %151 = vmatprep.subr.bf16.mxu0 %v216_v19  ;;  %v97_v55 = vrot.slane %v92_v53, %v96_v52  ;;  %v101_v56 = vrot.slane %v92_v53, %v100_v54 }
   0xc   :  { %152 = vmatpush1.bf16.msra.mxu0 %v218_v20 }
   0xd   :  { %153 = vmatprep.subr.bf16.mxu0 %v219_v21 }
  0x10   :  { %154 = vmatpush1.bf16.msra.mxu0 %v221_v22 }
  0x90   :  { %v28_v4 = vpop.xlane.xlu0 %27 }
  0x91   :  { %v33_v5 = vmul.f32 0.015625, %v28_v4 }
  0x93   :  { %v35_v6 = vsub.f32 %v21_v0, %v33_v5 }
  0x94   :  { %v31_v7 = vpop.xlane.xlu0 %30 }
  0x95   :  { %v34_v8 = vmul.f32 0.015625, %v31_v7  ;;  %v37_v9 = vmul.f32 %v35_v6, %v35_v6  ;;  %v71_v41 = vmul.f32 %v198_v39, %v35_v6 }
  0x97   :  { %v36_v10 = vsub.f32 %v22_v1, %v34_v8  ;;  %v39_v11 = vsel %vm25_vm0, %v37_v9, 0.0 }
  0x98   :  { %40 = vadd.xlane.f32.xlu1 %v39_v11 }
  0x99   :  { %v38_v12 = vmul.f32 %v36_v10, %v36_v10  ;;  %v72_v42 = vmul.f32 %v198_v39, %v36_v10 }
  0x9b   :  { %v42_v13 = vsel %vm25_vm0, %v38_v12, 0.0 }
  0x9c   :  { %43 = vadd.xlane.f32.xlu1 %v42_v13 }
 0x125   :  { %v41_v23 = vpop.xlane.xlu1 %40 }
 0x126   :  { %v45_v24 = vmul.f32 0.015873017, %v41_v23 }
 0x128   :  { %222 = vrsqrt.f32 %v45_v24  ;;  %vm49_vm1 = vcmp.eq.f32.partialorder %v45_v24, inf  ;;  %v52_v29 = vand.u32 2147483648, %v45_v24  ;;  %vm51_vm2 = vcmp.eq.f32.partialorder %v45_v24, 0.0 }
 0x129   :  { %v44_v25 = vpop.xlane.xlu1 %43 }
 0x12a   :  { %v46_v26 = vmul.f32 0.015873017, %v44_v25 }
 0x12c   :  { %224 = vrsqrt.f32 %v46_v26  ;;  %vm56_vm3 = vcmp.eq.f32.partialorder %v46_v26, inf  ;;  %v59_v35 = vand.u32 2147483648, %v46_v26  ;;  %vm58_vm4 = vcmp.eq.f32.partialorder %v46_v26, 0.0 }
 0x132   :  { %v223_v27 = vpop.eup %222 }
 0x133   :  { %v48_v28 = vmul.f32 %v223_v27, %v45_v24 }
 0x135   :  { %v50_v30 = vsel %vm49_vm1, %v45_v24, %v48_v28 }
 0x136   :  { %v225_v31 = vpop.eup %224  ;;  %v53_v32 = vsel %vm51_vm2, %v52_v29, %v50_v30 }
 0x137   :  { %v61_v33 = vadd.f32 1e-06, %v53_v32  ;;  %v55_v34 = vmul.f32 %v225_v31, %v46_v26 }
 0x139   :  { %226 = vrcp.f32 %v61_v33  ;;  %v57_v36 = vsel %vm56_vm3, %v46_v26, %v55_v34 }
 0x13a   :  { %v60_v37 = vsel %vm58_vm4, %v59_v35, %v57_v36 }
 0x13b   :  { %v62_v38 = vadd.f32 1e-06, %v60_v37 }
 0x13d   :  { %228 = vrcp.f32 %v62_v38 }
 0x143   :  { %v227_v40 = vpop.eup %226 }
 0x144   :  { %v73_v43 = vmul.f32 %v227_v40, %v71_v41 }
 0x146   :  { %v81_v47 = vadd.f32 %v199_v45, %v73_v43 }
 0x147   :  { %v229_v44 = vpop.eup %228 }
 0x148   :  { %v74_v46 = vmul.f32 %v229_v44, %v72_v42 }
 0x14a   :  { %v82_v48 = vadd.f32 %v199_v45, %v74_v46 }
 0x14c   :  { %v83_v49 = vpack.c.bf16 %v82_v48, %v81_v47 }
 0x14e   :  { %208 = vmatmul.mubr.msk.bf16.vlgmr.msra.gmra.mrb[0].mxu0 %vm25_vm0, %v83_v49 }
 0x221   :  { %v181_v57 = vpop.f32.mrb[0].mxu0 }
 0x222   :  { %v182_v58 = vadd.f32 %v181_v57, %v97_v55  ;;  %v183_v59 = vpop.f32.mrb[1].mxu0 }
 0x223   :  { %v184_v60 = vadd.f32 %v183_v59, %v101_v56  ;;  %v185_v61 = vpop.f32.mrb[2].mxu0 }
 0x224   :  { %190 = vst [vmem:[%s324_s5] sm:$0xff] %v182_v58  ;;  %v186_v62 = vadd.f32 %v185_v61, %v97_v55  ;;  %v187_v63 = vpop.f32.mrb[3].mxu0 }
 0x225   :  { %191 = vst.msk [vmem:[%s324_s5 + $0x8] sm:$0xff] %vm25_vm0, %v184_v60  ;;  %v188_v0 = vadd.f32 %v187_v63, %v101_v56 }
 0x226   :  { %192 = vst [vmem:[%s324_s5 + $0x10] sm:$0xff] %v186_v62 }
 0x227   :  { %193 = vst.msk [vmem:[%s324_s5 + $0x18] sm:$0xff] %vm25_vm0, %v188_v0 }

// kernel: transformer_encoder_forward.11
= control target key start
LH: loop header
LB: loop body
LE: loop exit
PB: predicated region body
PF: predicated region fallthrough
CT: control target
= control target key end

     0   :  { %v146_v0 = vmov 0.0   ;;  %vm147_vm0 = vmmov 0   ;;  %vm53_vm1 = vcmask 523264   ;;  %s209_s1 = inlined_call_operand.vmem [shape: bf16[64,64], index: 1, kind: input, shape index: {}]   ;;  %s210_s0 = inlined_call_operand.vmem [shape: f32[16,64], index: 0, kind: input, shape index: {}]   ;;  %s211_s3 = inlined_call_operand.vmem [shape: f32[16,64], index: 3, kind: input, shape index: {}]   ;;  %s212_s2 = inlined_call_operand.vmem [shape: f32[1,64], index: 2, kind: input, shape index: {}]   ;;  %s213_s4 = inlined_call_operand.vmem [shape: f32[16,64], index: 4, kind: output, shape index: {}]  }
   0x1   :  { %128 = vmatprep.subr.bf16.mxu0 %v146_v0  ;;  %v142_v1 = vld [vmem:[%s209_s1] sm:$0xff]   ;;  %136 = vmatprep.mubr.msk.bf16.mxu0 %vm147_vm0, %v146_v0  ;;  %v143_v2 = vld [vmem:[%s209_s1 + $0x8] sm:$0xff]   ;;  %v144_v3 = vld [vmem:[%s209_s1 + $0x10] sm:$0xff]  }
   0x2   :  { %129 = vmatpush3.bf16.msra.mxu0 %v142_v1  ;;  %v145_v4 = vld [vmem:[%s209_s1 + $0x18] sm:$0xff]   ;;  %v18_v5 = vld [vmem:[%s210_s0] sm:$0xff]  ;;  %v19_v6 = vld [vmem:[%s210_s0 + $0x8] sm:$0xff] }
   0x3   :  { %130 = vmatprep.subr.bf16.mxu0 %v146_v0  ;;  %v20_v7 = vpack.c.bf16 %v19_v6, %v18_v5  ;;  %v98_v8 = vld [vmem:[%s211_s3] sm:$0xff]  ;;  %v99_v11 = vld [vmem:[%s211_s3 + $0x8] sm:$0xff] }
   0x4   :  { %v122_v10 = vld [vmem:[%s212_s2] ss:$0 sm:$0xff] }
   0x6   :  { %131 = vmatpush3.bf16.msra.mxu0 %v143_v2 }
   0x7   :  { %132 = vmatprep.subr.bf16.mxu0 %v146_v0 }
   0xa   :  { %133 = vmatpush3.bf16.msra.mxu0 %v144_v3 }
   0xb   :  { %134 = vmatprep.subr.bf16.mxu0 %v146_v0 }
   0xe   :  { %135 = vmatpush3.bf16.msra.mxu0 %v145_v4 }
  0x11   :  { %137 = vmatmul.mubr.msk.bf16.vlgmr.msra.gmra.mrb[0].mxu0 %vm53_vm1, %v20_v7 }
  0xe4   :  { %v91_v9 = vpop.f32.mrb[0].mxu0 }
  0xe5   :  { %v100_v12 = vadd.f32 %v98_v8, %v91_v9  ;;  %v138_v13 = vpop.f32.mrb[1].mxu0 }
  0xe6   :  { %v94_v14 = vpop.f32.mrb[2].mxu0 }
  0xe7   :  { %v109_v15 = vadd.f32 %v122_v10, %v100_v12  ;;  %v101_v16 = vadd.f32 %v99_v11, %v94_v14  ;;  %v139_v17 = vpop.f32.mrb[3].mxu0 }
  0xe9   :  { %111 = vst.msk [vmem:[%s213_s4] sm:$0xff] %vm53_vm1, %v109_v15  ;;  %v110_v18 = vadd.f32 %v122_v10, %v101_v16 }
  0xeb   :  { %112 = vst.msk [vmem:[%s213_s4 + $0x8] sm:$0xff] %vm53_vm1, %v110_v18 }

// kernel: transformer_encoder_forward.10
= control target key start
LH: loop header
LB: loop body
LE: loop exit
PB: predicated region body
PF: predicated region fallthrough
CT: control target
= control target key end

     0   :  { %s1422_s9 = smov 0   ;;  %s1611_s0 = inlined_call_operand.vmem [shape: f32[2,8,192], index: 0, kind: input, shape index: {}]   ;;  %s1612_s1 = inlined_call_operand.vmem [shape: f32[2,1,8], index: 1, kind: input, shape index: {}]   ;;  %s1613_s2 = inlined_call_operand.vmem [shape: f32[2,8,64], index: 2, kind: output, shape index: {}]  }
   0x1 LB: > { %s1169_s10 = sadd.s32 4294967295, %s1388_s9   ;;  %p1173_p0 = scmp.ge.s32.totalorder %s1388_s9, 1  ;;  %s1388_s9 = sphi %s1422_s9, %s12_s9  }
   0x2   : > { %p120_p1 = scmp.lt.s32.totalorder %s1388_s9, 3 }
   0x4   : > { %p121_p2 = pnand %p1173_p0, %p120_p1 }
   0x5   : > { %p144_p3 = scmp.lt.s32.totalorder (!%p121_p2), %s1169_s10, 1  ;;  %v1390_v0 = vmov (!%p121_p2), 0.0   ;;  %vm1391_vm0 = vmmov (!%p121_p2), 0   ;;  %s1392_s15 = smov (!%p121_p2), 64   ;;  %vm165_vm1 = vcmask (!%p121_p2), 64512   ;;  %vm235_vm2 = vcmask (!%p121_p2), 1043456  }
   0x6   : > { %124 = sbr.rel (%p121_p2) target bundleno = 1628 (0x65c), region = 28  ;;  %1229 = vmatprep.subr.bf16.mxu0 (!%p121_p2), %v1390_v0  ;;  %1231 = vmatprep.mubr.msk.bf16.mxu0 (!%p121_p2), %vm1391_vm0, %v1390_v0  ;;  %s1393_s16 = smov (!%p121_p2), 56   ;;  %vm1093_vm3 = vcmask (!%p121_p2), 130048   ;;  %vm1095_vm4 = vcmask (!%p121_p2), 195584   ;;  %vm1097_vm5 = vcmask (!%p121_p2), 261120   ;;  %vm1099_vm6 = vcmask (!%p121_p2), 326656  }
   0x7   : > { %1235 = vmatprep.subr.bf16.mxu1 (!%p121_p2), %v1390_v0  ;;  %1237 = vmatprep.mubr.msk.bf16.mxu1 (!%p121_p2), %vm1391_vm0, %v1390_v0  ;;  %s1394_s20 = smov (!%p121_p2), 104   ;;  %s1395_s21 = smov (!%p121_p2), 80   ;;  %vm1101_vm7 = vcmask (!%p121_p2), 392192   ;;  %vm1103_vm8 = vcmask (!%p121_p2), 457728   ;;  %vm1105_vm9 = vcmask (!%p121_p2), 523264  }
   0x8   : > { %s1396_s22 = smov (!%p121_p2), 72   ;;  %s1397_s23 = smov (!%p121_p2), 120  }
   0x9   : > { %s1398_s24 = smov (!%p121_p2), 48   ;;  %s1399_s25 = smov (!%p121_p2), 112  }
   0xa   : > { %s1400_s26 = smov (!%p121_p2), 40   ;;  %s1401_s27 = smov (!%p121_p2), 32  }
   0xb   : > { %s1402_s28 = smov (!%p121_p2), 96   ;;  %s1403_s29 = smov (!%p121_p2), 24  }
   0xc   : > { %s1404_s30 = smov (!%p121_p2), 88   ;;  %s1405_s3 = smov (!%p121_p2), 16  }
   0xd   : > { %s1615_s10 = smov (!%p144_p3, %s1169_s10), 1  ;;  %s1406_s4 = smov 8  }
   0xe   : > { %s1196_s11 = sshll.u32 %s1615_s10, 4  ;;  %s151_s19 = scalar_lea.vmem %s1612_s1, %s1615_s10 }
   0xf   : > { %s1442_s14 = scalar_lea.vmem %s1611_s0, %s1196_s11  ;;  %v1455_v6 = vld [vmem:[%s151_s19] ss:$0 sm:$0xff]  ;;  %s1176_s5 = sshll.u32 %s1615_s10, 3 }
  0x10   : > { %v157_v1 = vld [vmem:[%s1442_s14] sm:$0xff]  ;;  %v158_v18 = vld [vmem:[%s1442_s14 + $0x8] sm:$0xff]  ;;  %s155_s8 = scalar_lea.vmem %s1613_s2, %s1176_s5 }
  0x11   : > { %v160_v2 = vpack.c.bf16 %v157_v1, %v157_v1  ;;  %v1464_v19 = vpack.c.bf16 %v158_v18, %v158_v18 }
  0x13   : > { %163 = vrot.lane.b32.xlu0 %v160_v2, %s1392_s15  ;;  %281 = vrot.lane.b32.xlu1 %v160_v2, %s1393_s16  ;;  %v237_v20 = vsel %vm235_vm2, %v1464_v19, 0 }
  0x14   : > { %1236 = vmatpush3.bf16.msra.mxu1 %v237_v20 }
  0x15   : > { %1241 = vmatprep.subr.bf16.mxu1 %v1390_v0 }
  0x85   : > { %v164_v3 = vpop.permute.xlu0 %163  ;;  %v282_v21 = vpop.permute.xlu1 %281 }
  0x86   : > { %v170_v4 = vsel %vm165_vm1, %v164_v3, 0  ;;  %v287_v28 = vsel %vm165_vm1, %v282_v21, 0 }
  0x87   : > { %1230 = vmatpush3.bf16.xpose.msra.mxu0 %v170_v4 }
  0x88   : > { %1247 = vmatprep.subr.bf16.mxu0 %v1390_v0 }
  0x8e   : > { %1232 = vmatmul.mubr.msk.bf16.vlgmr.msra.gmra.mrb[0].mxu0 %vm165_vm1, %v160_v2 }
  0x8f   : > { %1249 = vmatprep.mubr.msk.bf16.mxu0 %vm1391_vm0, %v1390_v0 }
 0x161   : > { %v206_v5 = vpop.f32.mrb[0].mxu0 }
 0x162   : > { %v212_v7 = vmul.f32 0.35355338, %v206_v5  ;;  %v1233_v8 = vpop.f32.mrb[1].mxu0 }
 0x163   : > { %v209_v9 = vpop.f32.mrb[2].mxu0 }
 0x164   : > { %v1234_v10 = vpop.f32.mrb[3].mxu0  ;;  %v219_v11 = vadd.f32 %v1455_v6, %v212_v7 }
 0x166   : > { %v220_v12 = vsel %vm165_vm1, %v219_v11, -inf }
 0x167   : > { %221 = vmax.xlane.f32.xlu0 %v220_v12 }
 0x17d   : > { %504 = vrot.lane.b32.xlu0 %v160_v2, %s1394_s20 }
 0x181   : > { %840 = vrot.lane.b32.xlu0 %v160_v2, %s1395_s21 }
 0x185   : > { %952 = vrot.lane.b32.xlu0 %v160_v2, %s1396_s22 }
 0x1f4   : > { %v222_v13 = vpop.xlane.xlu0 %221 }
 0x1f5   : > { %v223_v14 = vsub.f32 %v219_v11, %v222_v13 }
 0x1f7   : > { %v224_v15 = vmul.f32 1.442695, %v223_v14 }
 0x1f8   : > { %v505_v35 = vpop.permute.xlu0 %504 }
 0x1f9   : > { %1350 = vpow2.f32 %v224_v15 }
 0x1fc   : > { %v841_v43 = vpop.permute.xlu0 %840 }
 0x200   : > { %v953_v45 = vpop.permute.xlu0 %952 }
 0x203   : > { %v1351_v16 = vpop.eup %1350 }
 0x204   : > { %v226_v17 = vsel %vm165_vm1, %v1351_v16, 0.0 }
 0x205   : > { %227 = vadd.xlane.f32.xlu1 %v226_v17 }
 0x216   : > { %279 = vrot.lane.b32.xlu1 %v160_v2, %s1397_s23 }
 0x21a   : > { %394 = vrot.lane.b32.xlu1 %v160_v2, %s1398_s24 }
 0x21e   : > { %392 = vrot.lane.b32.xlu1 %v160_v2, %s1399_s25 }
 0x222   : > { %506 = vrot.lane.b32.xlu1 %v160_v2, %s1400_s26 }
 0x226   : > { %618 = vrot.lane.b32.xlu1 %v160_v2, %s1401_s27 }
 0x22a   : > { %616 = vrot.lane.b32.xlu1 %v160_v2, %s1402_s28 }
 0x22e   : > { %730 = vrot.lane.b32.xlu1 %v160_v2, %s1403_s29 }
 0x232   : > { %728 = vrot.lane.b32.xlu1 %v160_v2, %s1404_s30 }
 0x236   : > { %842 = vrot.lane.b32.xlu1 %v160_v2, %s1405_s3 }
 0x23a   : > { %954 = vrot.lane.b32.xlu1 %v160_v2, %s1406_s4 }
 0x292   : > { %v228_v22 = vpop.xlane.xlu1 %227 }
 0x293   : > { %1352 = vrcp.f32 %v228_v22 }
 0x296   : > { %v280_v23 = vpop.permute.xlu1 %279 }
 0x29a   : > { %v395_v25 = vpop.permute.xlu1 %394 }
 0x29b   : > { %v400_v30 = vsel %vm165_vm1, %v395_v25, 0 }
 0x29d   : > { %v1353_v24 = vpop.eup %1352 }
 0x29e   : > { %v230_v26 = vmul.f32 %v1353_v24, %v1351_v16  ;;  %v393_v29 = vpop.permute.xlu1 %392 }
 0x2a0   : > { %v231_v27 = vpack.c.bf16 %v230_v26, %v230_v26 }
 0x2a2   : > { %1238 = vmatmul.mubr.msk.bf16.vlgmr.msra.gmra.mrb[0].mxu1 %vm165_vm1, %v231_v27  ;;  %v507_v31 = vpop.permute.xlu1 %506 }
 0x2a3   : > { %1242 = vmatpush3.bf16.xpose.msra.mxu1 %v287_v28  ;;  %1243 = vmatprep.mubr.msk.bf16.mxu1 %vm1391_vm0, %v1390_v0  ;;  %v512_v33 = vsel %vm165_vm1, %v507_v31, 0 }
 0x2a4   : > { %1253 = vmatprep.subr.bf16.mxu1 %v1390_v0 }
 0x2a6   : > { %v619_v32 = vpop.permute.xlu1 %618 }
 0x2a7   : > { %v624_v36 = vsel %vm165_vm1, %v619_v32, 0 }
 0x2aa   : > { %1244 = vmatmul.mubr.msk.bf16.vlgmr.msra.gmra.mrb[4].mxu1 %vm165_vm1, %v280_v23  ;;  %v617_v34 = vpop.permute.xlu1 %616 }
 0x2ab   : > { %1254 = vmatpush3.bf16.xpose.msra.mxu1 %v400_v30  ;;  %1255 = vmatprep.mubr.msk.bf16.mxu1 %vm1391_vm0, %v1390_v0 }
 0x2ac   : > { %1265 = vmatprep.subr.bf16.mxu1 %v1390_v0 }
 0x2ae   : > { %v731_v37 = vpop.permute.xlu1 %730 }
 0x2af   : > { %v736_v39 = vsel %vm165_vm1, %v731_v37, 0 }
 0x2b2   : > { %1256 = vmatmul.mubr.msk.bf16.vlgmr.msra.gmra.mrb[8].mxu1 %vm165_vm1, %v393_v29  ;;  %v729_v38 = vpop.permute.xlu1 %728 }
 0x2b3   : > { %1266 = vmatpush3.bf16.xpose.msra.mxu1 %v512_v33  ;;  %1267 = vmatprep.mubr.msk.bf16.mxu1 %vm1391_vm0, %v1390_v0 }
 0x2b4   : > { %1277 = vmatprep.subr.bf16.mxu1 %v1390_v0 }
 0x2b6   : > { %v843_v40 = vpop.permute.xlu1 %842 }
 0x2b7   : > { %v848_v41 = vsel %vm165_vm1, %v843_v40, 0 }
 0x2ba   : > { %1268 = vmatmul.mubr.msk.bf16.vlgmr.msra.gmra.mrb[12].mxu1 %vm165_vm1, %v505_v35  ;;  %v955_v42 = vpop.permute.xlu1 %954 }
 0x2bb   : > { %1278 = vmatpush3.bf16.xpose.msra.mxu1 %v624_v36  ;;  %1279 = vmatprep.mubr.msk.bf16.mxu1 %vm1391_vm0, %v1390_v0  ;;  %v960_v44 = vsel %vm165_vm1, %v955_v42, 0 }
 0x2bc   : > { %1289 = vmatprep.subr.bf16.mxu1 %v1390_v0 }
 0x2c2   : > { %1280 = vmatmul.mubr.msk.bf16.vlgmr.msra.gmra.mrb[16].mxu1 %vm165_vm1, %v617_v34 }
 0x2c3   : > { %1290 = vmatpush3.bf16.xpose.msra.mxu1 %v736_v39  ;;  %1291 = vmatprep.mubr.msk.bf16.mxu1 %vm1391_vm0, %v1390_v0 }
 0x2c4   : > { %1301 = vmatprep.subr.bf16.mxu1 %v1390_v0 }
 0x2ca   : > { %1292 = vmatmul.mubr.msk.bf16.vlgmr.msra.gmra.mrb[20].mxu1 %vm165_vm1, %v729_v38 }
 0x2cb   : > { %1302 = vmatpush3.bf16.xpose.msra.mxu1 %v848_v41  ;;  %1303 = vmatprep.mubr.msk.bf16.mxu1 %vm1391_vm0, %v1390_v0 }
 0x2cc   : > { %1313 = vmatprep.subr.bf16.mxu1 %v1390_v0 }
 0x2d2   : > { %1304 = vmatmul.mubr.msk.bf16.vlgmr.msra.gmra.mrb[24].mxu1 %vm165_vm1, %v841_v43 }
 0x2d3   : > { %1314 = vmatpush3.bf16.xpose.msra.mxu1 %v960_v44  ;;  %1315 = vmatprep.mubr.msk.bf16.mxu1 %vm1391_vm0, %v1390_v0 }
 0x2da   : > { %1316 = vmatmul.mubr.msk.bf16.vlgmr.msra.gmra.mrb[28].mxu1 %vm165_vm1, %v953_v45 }
 0x375   : > { %v1514_v46 = vpop.f32.mrb[0].mxu1 }
 0x376   : > { %v1239_v47 = vpop.f32.mrb[1].mxu1 }
 0x377   : > { %v276_v48 = vpop.f32.mrb[2].mxu1 }
 0x378   : > { %v1240_v49 = vpop.f32.mrb[3].mxu1 }
 0x37d   : > { %v323_v50 = vpop.f32.mrb[4].mxu1 }
 0x37e   : > { %v329_v51 = vmul.f32 0.35355338, %v323_v50  ;;  %v1245_v52 = vpop.f32.mrb[5].mxu1 }
 0x37f   : > { %v326_v53 = vpop.f32.mrb[6].mxu1 }
 0x380   : > { %v1246_v54 = vpop.f32.mrb[7].mxu1  ;;  %v330_v55 = vadd.f32 %v1455_v6, %v329_v51 }
 0x382   : > { %v331_v56 = vsel %vm165_vm1, %v330_v55, -inf }
 0x383   : > { %332 = vmax.xlane.f32.xlu1 %v331_v56 }
 0x385   : > { %v436_v57 = vpop.f32.mrb[8].mxu1 }
 0x386   : > { %v442_v58 = vmul.f32 0.35355338, %v436_v57  ;;  %v1257_v59 = vpop.f32.mrb[9].mxu1 }
 0x387   : > { %v439_v60 = vpop.f32.mrb[10].mxu1 }
 0x388   : > { %v1258_v61 = vpop.f32.mrb[11].mxu1  ;;  %v443_v62 = vadd.f32 %v1455_v6, %v442_v58 }
 0x38a   : > { %v444_v63 = vsel %vm165_vm1, %v443_v62, -inf }
 0x38b   : > { %445 = vmax.xlane.f32.xlu0 %v444_v63 }
 0x38d   : > { %v548_v1 = vpop.f32.mrb[12].mxu1 }
 0x38e   : > { %v554_v2 = vmul.f32 0.35355338, %v548_v1  ;;  %v1269_v3 = vpop.f32.mrb[13].mxu1 }
 0x38f   : > { %v551_v4 = vpop.f32.mrb[14].mxu1 }
 0x390   : > { %v555_v5 = vadd.f32 %v1455_v6, %v554_v2  ;;  %v1270_v7 = vpop.f32.mrb[15].mxu1 }
 0x392   : > { %v556_v8 = vsel %vm165_vm1, %v555_v5, -inf }
 0x393   : > { %557 = vmax.xlane.f32.xlu0 %v556_v8 }
 0x395   : > { %v660_v9 = vpop.f32.mrb[16].mxu1 }
 0x396   : > { %v666_v10 = vmul.f32 0.35355338, %v660_v9  ;;  %v1281_v11 = vpop.f32.mrb[17].mxu1 }
 0x397   : > { %v663_v12 = vpop.f32.mrb[18].mxu1 }
 0x398   : > { %v667_v13 = vadd.f32 %v1455_v6, %v666_v10  ;;  %v1282_v14 = vpop.f32.mrb[19].mxu1 }
 0x39a   : > { %v668_v15 = vsel %vm165_vm1, %v667_v13, -inf }
 0x39b   : > { %669 = vmax.xlane.f32.xlu1 %v668_v15 }
 0x39d   : > { %v772_v16 = vpop.f32.mrb[20].mxu1 }
 0x39e   : > { %v778_v17 = vmul.f32 0.35355338, %v772_v16  ;;  %v1293_v18 = vpop.f32.mrb[21].mxu1 }
 0x39f   : > { %v775_v20 = vpop.f32.mrb[22].mxu1 }
 0x3a0   : > { %v779_v21 = vadd.f32 %v1455_v6, %v778_v17  ;;  %v1294_v22 = vpop.f32.mrb[23].mxu1 }
 0x3a2   : > { %v780_v23 = vsel %vm165_vm1, %v779_v21, -inf }
 0x3a3   : > { %781 = vmax.xlane.f32.xlu0 %v780_v23 }
 0x3a5   : > { %v884_v24 = vpop.f32.mrb[24].mxu1 }
 0x3a6   : > { %v890_v25 = vmul.f32 0.35355338, %v884_v24  ;;  %v1305_v26 = vpop.f32.mrb[25].mxu1 }
 0x3a7   : > { %v887_v27 = vpop.f32.mrb[26].mxu1 }
 0x3a8   : > { %v891_v28 = vadd.f32 %v1455_v6, %v890_v25  ;;  %v1306_v29 = vpop.f32.mrb[27].mxu1 }
 0x3aa   : > { %v892_v30 = vsel %vm165_vm1, %v891_v28, -inf }
 0x3ab   : > { %893 = vmax.xlane.f32.xlu1 %v892_v30 }
 0x3ad   : > { %v996_v31 = vpop.f32.mrb[28].mxu1 }
 0x3ae   : > { %v1002_v32 = vmul.f32 0.35355338, %v996_v31  ;;  %v1317_v33 = vpop.f32.mrb[29].mxu1 }
 0x3af   : > { %v999_v34 = vpop.f32.mrb[30].mxu1 }
 0x3b0   : > { %v1003_v35 = vadd.f32 %v1455_v6, %v1002_v32  ;;  %v1318_v36 = vpop.f32.mrb[31].mxu1 }
 0x3b2   : > { %v1004_v37 = vsel %vm165_vm1, %v1003_v35, -inf }
 0x3b3   : > { %1005 = vmax.xlane.f32.xlu0 %v1004_v37 }
 0x3bc   : > { %344 = vrot.lane.b32.xlu1 %v1464_v19, %s1397_s23 }
 0x3c9   : > { %456 = vrot.lane.b32.xlu0 %v1464_v19, %s1399_s25 }
 0x410   : > { %v333_v38 = vpop.xlane.xlu1 %332 }
 0x411   : > { %v334_v39 = vsub.f32 %v330_v55, %v333_v38 }
 0x413   : > { %v335_v40 = vmul.f32 1.442695, %v334_v39 }
 0x415   : > { %1354 = vpow2.f32 %v335_v40 }
 0x418   : > { %v446_v41 = vpop.xlane.xlu0 %445 }
 0x419   : > { %v447_v42 = vsub.f32 %v443_v62, %v446_v41 }
 0x41b   : > { %v448_v43 = vmul.f32 1.442695, %v447_v42 }
 0x41d   : > { %1356 = vpow2.f32 %v448_v43 }
 0x41f   : > { %v1355_v44 = vpop.eup %1354 }
 0x420   : > { %v558_v6 = vpop.xlane.xlu0 %557  ;;  %v337_v45 = vsel %vm165_vm1, %v1355_v44, 0.0 }
 0x421   : > { %v559_v47 = vsub.f32 %v555_v5, %v558_v6  ;;  %338 = vadd.xlane.f32.xlu1 %v337_v45 }
 0x423   : > { %v560_v48 = vmul.f32 1.442695, %v559_v47 }
 0x425   : > { %1358 = vpow2.f32 %v560_v48 }
 0x427   : > { %v1357_v49 = vpop.eup %1356 }
 0x428   : > { %v450_v50 = vsel %vm165_vm1, %v1357_v49, 0.0  ;;  %v670_v53 = vpop.xlane.xlu1 %669 }
 0x429   : > { %451 = vadd.xlane.f32.xlu0 %v450_v50  ;;  %v671_v57 = vsub.f32 %v667_v13, %v670_v53 }
 0x42b   : > { %v672_v59 = vmul.f32 1.442695, %v671_v57 }
 0x42d   : > { %1360 = vpow2.f32 %v672_v59 }
 0x42f   : > { %v1536_v51 = vpop.eup %1358 }
 0x430   : > { %v562_v52 = vsel %vm165_vm1, %v1536_v51, 0.0  ;;  %v782_v58 = vpop.xlane.xlu0 %781 }
 0x431   : > { %563 = vadd.xlane.f32.xlu1 %v562_v52  ;;  %v783_v60 = vsub.f32 %v779_v21, %v782_v58 }
 0x433   : > { %v784_v63 = vmul.f32 1.442695, %v783_v60 }
 0x435   : > { %1362 = vpow2.f32 %v784_v63 }
 0x437   : > { %v1361_v4 = vpop.eup %1360 }
 0x438   : > { %v894_v54 = vpop.xlane.xlu1 %893  ;;  %v674_v5 = vsel %vm165_vm1, %v1361_v4, 0.0 }
 0x439   : > { %v895_v62 = vsub.f32 %v891_v28, %v894_v54 }
 0x43b   : > { %v896_v2 = vmul.f32 1.442695, %v895_v62 }
 0x43c   : > { %v345_v55 = vpop.permute.xlu1 %344 }
 0x43d   : > { %v350_v56 = vsel %vm235_vm2, %v345_v55, 0  ;;  %1364 = vpow2.f32 %v896_v2 }
 0x43e   : > { %1248 = vmatpush3.bf16.msra.mxu0 %v350_v56 }
 0x43f   : > { %568 = vrot.lane.b32.xlu0 %v1464_v19, %s1394_s20  ;;  %1259 = vmatprep.subr.bf16.mxu0 %v1390_v0  ;;  %v1363_v7 = vpop.eup %1362 }
 0x440   : > { %v1006_v61 = vpop.xlane.xlu0 %1005  ;;  %v786_v9 = vsel %vm165_vm1, %v1363_v7, 0.0 }
 0x441   : > { %v1007_v1 = vsub.f32 %v1003_v35, %v1006_v61 }
 0x442   : > { %680 = vrot.lane.b32.xlu1 %v1464_v19, %s1402_s28 }
 0x443   : > { %v1008_v3 = vmul.f32 1.442695, %v1007_v1 }
 0x444   : > { %v457_v14 = vpop.permute.xlu0 %456 }
 0x445   : > { %1366 = vpow2.f32 %v1008_v3  ;;  %v462_v20 = vsel %vm235_vm2, %v457_v14, 0 }
 0x447   : > { %v1547_v8 = vpop.eup %1364 }
 0x448   : > { %v898_v11 = vsel %vm165_vm1, %v1547_v8, 0.0 }
 0x44f   : > { %v1550_v10 = vpop.eup %1366 }
 0x450   : > { %v1010_v12 = vsel %vm165_vm1, %v1550_v10, 0.0 }
 0x45e   : > { %675 = vadd.xlane.f32.xlu0 %v674_v5 }
 0x462   : > { %787 = vadd.xlane.f32.xlu0 %v786_v9 }
 0x466   : > { %899 = vadd.xlane.f32.xlu1 %v898_v11  ;;  %1011 = vadd.xlane.f32.xlu0 %v1010_v12 }
 0x477   : > { %904 = vrot.lane.b32.xlu1 %v1464_v19, %s1395_s21 }
 0x47b   : > { %1016 = vrot.lane.b32.xlu1 %v1464_v19, %s1396_s22 }
 0x47c   : > { %792 = vrot.lane.b32.xlu0 %v1464_v19, %s1404_s30 }
 0x4ae   : > { %v339_v13 = vpop.xlane.xlu1 %338 }
 0x4af   : > { %1368 = vrcp.f32 %v339_v13 }
 0x4b6   : > { %v452_v15 = vpop.xlane.xlu0 %451 }
 0x4b7   : > { %1370 = vrcp.f32 %v452_v15 }
 0x4b9   : > { %v1369_v16 = vpop.eup %1368 }
 0x4ba   : > { %v341_v17 = vmul.f32 %v1369_v16, %v1355_v44  ;;  %v569_v23 = vpop.permute.xlu0 %568 }
 0x4bb   : > { %v574_v25 = vsel %vm235_vm2, %v569_v23, 0 }
 0x4bc   : > { %v342_v18 = vpack.c.bf16 %v341_v17, %v341_v17 }
 0x4be   : > { %1250 = vmatmul.mubr.msk.bf16.vlgmr.msra.gmra.mrb[4].mxu0 %vm165_vm1, %v342_v18  ;;  %v564_v21 = vpop.xlane.xlu1 %563 }
 0x4bf   : > { %1372 = vrcp.f32 %v564_v21  ;;  %1260 = vmatpush3.bf16.msra.mxu0 %v462_v20  ;;  %1261 = vmatprep.mubr.msk.bf16.mxu0 %vm1391_vm0, %v1390_v0 }
 0x4c0   : > { %1271 = vmatprep.subr.bf16.mxu0 %v1390_v0 }
 0x4c1   : > { %v1371_v19 = vpop.eup %1370 }
 0x4c2   : > { %v454_v22 = vmul.f32 %v1371_v19, %v1357_v49  ;;  %v681_v28 = vpop.permute.xlu1 %680 }
 0x4c3   : > { %v686_v30 = vsel %vm235_vm2, %v681_v28, 0 }
 0x4c4   : > { %v455_v24 = vpack.c.bf16 %v454_v22, %v454_v22 }
 0x4c6   : > { %1262 = vmatmul.mubr.msk.bf16.vlgmr.msra.gmra.mrb[8].mxu0 %vm165_vm1, %v455_v24 }
 0x4c7   : > { %1272 = vmatpush3.bf16.msra.mxu0 %v574_v25  ;;  %1273 = vmatprep.mubr.msk.bf16.mxu0 %vm1391_vm0, %v1390_v0 }
 0x4c8   : > { %1283 = vmatprep.subr.bf16.mxu0 %v1390_v0 }
 0x4c9   : > { %v1373_v26 = vpop.eup %1372 }
 0x4ca   : > { %v566_v27 = vmul.f32 %v1373_v26, %v1536_v51 }
 0x4cc   : > { %v567_v29 = vpack.c.bf16 %v566_v27, %v566_v27 }
 0x4ce   : > { %1274 = vmatmul.mubr.msk.bf16.vlgmr.msra.gmra.mrb[12].mxu0 %vm165_vm1, %v567_v29 }
 0x4cf   : > { %1284 = vmatpush3.bf16.msra.mxu0 %v686_v30  ;;  %1285 = vmatprep.mubr.msk.bf16.mxu0 %vm1391_vm0, %v1390_v0 }
 0x4d0   : > { %1295 = vmatprep.subr.bf16.mxu0 %v1390_v0 }
 0x4eb   : > { %v676_v31 = vpop.xlane.xlu0 %675 }
 0x4ec   : > { %1374 = vrcp.f32 %v676_v31 }
 0x4ef   : > { %v788_v32 = vpop.xlane.xlu0 %787 }
 0x4f0   : > { %1376 = vrcp.f32 %v788_v32 }
 0x4f3   : > { %v1012_v33 = vpop.xlane.xlu0 %1011  ;;  %v900_v34 = vpop.xlane.xlu1 %899 }
 0x4f4   : > { %1378 = vrcp.f32 %v900_v34 }
 0x4f5   : > { %1380 = vrcp.f32 %v1012_v33 }
 0x4f6   : > { %v1375_v35 = vpop.eup %1374 }
 0x4f7   : > { %v678_v36 = vmul.f32 %v1375_v35, %v1361_v4  ;;  %v793_v37 = vpop.permute.xlu0 %792  ;;  %v905_v42 = vpop.permute.xlu1 %904 }
 0x4f8   : > { %v798_v38 = vsel %vm235_vm2, %v793_v37, 0  ;;  %v910_v43 = vsel %vm235_vm2, %v905_v42, 0 }
 0x4f9   : > { %v679_v39 = vpack.c.bf16 %v678_v36, %v678_v36 }
 0x4fa   : > { %v1377_v40 = vpop.eup %1376 }
 0x4fb   : > { %1286 = vmatmul.mubr.msk.bf16.vlgmr.msra.gmra.mrb[16].mxu0 %vm165_vm1, %v679_v39  ;;  %v790_v41 = vmul.f32 %v1377_v40, %v1363_v7  ;;  %v1017_v47 = vpop.permute.xlu1 %1016 }
 0x4fc   : > { %1296 = vmatpush3.bf16.msra.mxu0 %v798_v38  ;;  %1297 = vmatprep.mubr.msk.bf16.mxu0 %vm1391_vm0, %v1390_v0  ;;  %v1022_v48 = vsel %vm235_vm2, %v1017_v47, 0 }
 0x4fd   : > { %1307 = vmatprep.subr.bf16.mxu0 %v1390_v0  ;;  %v791_v44 = vpack.c.bf16 %v790_v41, %v790_v41 }
 0x4fe   : > { %v1379_v6 = vpop.eup %1378 }
 0x4ff   : > { %v902_v45 = vmul.f32 %v1379_v6, %v1547_v8  ;;  %v1381_v50 = vpop.eup %1380 }
 0x500   : > { %v1014_v51 = vmul.f32 %v1381_v50, %v1550_v10 }
 0x501   : > { %v903_v49 = vpack.c.bf16 %v902_v45, %v902_v45 }
 0x502   : > { %v1015_v52 = vpack.c.bf16 %v1014_v51, %v1014_v51 }
 0x503   : > { %1298 = vmatmul.mubr.msk.bf16.vlgmr.msra.gmra.mrb[20].mxu0 %vm165_vm1, %v791_v44 }
 0x504   : > { %1308 = vmatpush3.bf16.msra.mxu0 %v910_v43  ;;  %1309 = vmatprep.mubr.msk.bf16.mxu0 %vm1391_vm0, %v1390_v0 }
 0x505   : > { %1319 = vmatprep.subr.bf16.mxu0 %v1390_v0 }
 0x50b   : > { %1310 = vmatmul.mubr.msk.bf16.vlgmr.msra.gmra.mrb[24].mxu0 %vm165_vm1, %v903_v49 }
 0x50c   : > { %1320 = vmatpush3.bf16.msra.mxu0 %v1022_v48  ;;  %1321 = vmatprep.mubr.msk.bf16.mxu0 %vm1391_vm0, %v1390_v0 }
 0x513   : > { %1322 = vmatmul.mubr.msk.bf16.vlgmr.msra.gmra.mrb[28].mxu0 %vm165_vm1, %v1015_v52 }
 0x591   : > { %v386_v53 = vpop.f32.mrb[4].mxu0 }
 0x592   : > { %1065 = vrot.lane.b32.xlu1 %v386_v53, %s1406_s4  ;;  %v1251_v54 = vpop.f32.mrb[5].mxu0 }
 0x593   : > { %v389_v55 = vpop.f32.mrb[6].mxu0 }
 0x594   : > { %v1252_v56 = vpop.f32.mrb[7].mxu0 }
 0x599   : > { %v498_v57 = vpop.f32.mrb[8].mxu0 }
 0x59a   : > { %1069 = vrot.lane.b32.xlu1 %v498_v57, %s1405_s3  ;;  %v1263_v58 = vpop.f32.mrb[9].mxu0 }
 0x59b   : > { %v501_v59 = vpop.f32.mrb[10].mxu0 }
 0x59c   : > { %v1264_v60 = vpop.f32.mrb[11].mxu0 }
 0x5a1   : > { %v610_v61 = vpop.f32.mrb[12].mxu0 }
 0x5a2   : > { %1073 = vrot.lane.b32.xlu0 %v610_v61, %s1403_s29  ;;  %v1275_v0 = vpop.f32.mrb[13].mxu0 }
 0x5a3   : > { %v613_v62 = vpop.f32.mrb[14].mxu0 }
 0x5a4   : > { %v1276_v63 = vpop.f32.mrb[15].mxu0 }
 0x5ce   : > { %v722_v1 = vpop.f32.mrb[16].mxu0 }
 0x5cf   : > { %1077 = vrot.lane.b32.xlu1 %v722_v1, %s1401_s27  ;;  %v1287_v2 = vpop.f32.mrb[17].mxu0 }
 0x5d0   : > { %v725_v3 = vpop.f32.mrb[18].mxu0 }
 0x5d1   : > { %v1288_v4 = vpop.f32.mrb[19].mxu0 }
 0x5d6   : > { %v834_v5 = vpop.f32.mrb[20].mxu0 }
 0x5d7   : > { %1081 = vrot.lane.b32.xlu0 %v834_v5, %s1400_s26  ;;  %v1299_v7 = vpop.f32.mrb[21].mxu0 }
 0x5d8   : > { %v837_v8 = vpop.f32.mrb[22].mxu0 }
 0x5d9   : > { %v1300_v9 = vpop.f32.mrb[23].mxu0 }
 0x5de   : > { %v946_v10 = vpop.f32.mrb[24].mxu0 }
 0x5df   : > { %1085 = vrot.lane.b32.xlu1 %v946_v10, %s1398_s24  ;;  %v1311_v11 = vpop.f32.mrb[25].mxu0 }
 0x5e0   : > { %v949_v12 = vpop.f32.mrb[26].mxu0 }
 0x5e1   : > { %v1312_v13 = vpop.f32.mrb[27].mxu0 }
 0x5e6   : > { %v1058_v14 = vpop.f32.mrb[28].mxu0 }
 0x5e7   : > { %1089 = vrot.lane.b32.xlu0 %v1058_v14, %s1393_s16  ;;  %v1323_v15 = vpop.f32.mrb[29].mxu0 }
 0x5e8   : > { %v1061_v16 = vpop.f32.mrb[30].mxu0 }
 0x5e9   : > { %v1324_v17 = vpop.f32.mrb[31].mxu0 }
 0x604   : > { %v1066_v18 = vpop.permute.xlu1 %1065 }
 0x605   : > { %v1092_v22 = vsel %vm165_vm1, %v1514_v46, %v1066_v18 }
 0x60c   : > { %v1070_v20 = vpop.permute.xlu1 %1069 }
 0x60d   : > { %v1094_v23 = vsel %vm1093_vm3, %v1092_v22, %v1070_v20 }
 0x614   : > { %v1074_v21 = vpop.permute.xlu0 %1073 }
 0x615   : > { %v1096_v25 = vsel %vm1095_vm4, %v1094_v23, %v1074_v21 }
 0x641   : > { %v1078_v19 = vpop.permute.xlu1 %1077 }
 0x642   : > { %v1098_v27 = vsel %vm1097_vm5, %v1096_v25, %v1078_v19 }
 0x649   : > { %v1082_v24 = vpop.permute.xlu0 %1081 }
 0x64a   : > { %v1100_v28 = vsel %vm1099_vm6, %v1098_v27, %v1082_v24 }
 0x651   : > { %v1086_v26 = vpop.permute.xlu1 %1085 }
 0x652   : > { %v1102_v29 = vsel %vm1101_vm7, %v1100_v28, %v1086_v26 }
 0x659   : > { %v1090_v30 = vpop.permute.xlu0 %1089 }
 0x65a   : > { %v1104_v31 = vsel %vm1103_vm8, %v1102_v29, %v1090_v30 }
 0x65b   : > { %1106 = vst.msk [vmem:[%s155_s8] sm:$0xff] %vm1105_vm9, %v1104_v31 }
 0x65c PF: > { %s12_s9 = sadd.s32 1, %s1388_s9  }
 0x65d   : > { %p9_p4 = scmp.ge.s32.totalorder %s12_s9, 4  }
 0x65f   :  { %11 = sbr.rel (!%p9_p4) target bundleno = 1 (0x1), region = 61 }

// kernel: transformer_encoder_forward.12
= control target key start
LH: loop header
LB: loop body
LE: loop exit
PB: predicated region body
PF: predicated region fallthrough
CT: control target
= control target key end

     0   :  { %vm31_vm0 = vcmask 523264   ;;  %v381_v15 = vmov 0.0   ;;  %vm382_vm1 = vmmov 0   ;;  %s524_s0 = inlined_call_operand.vmem [shape: f32[16,64], index: 0, kind: input, shape index: {}]   ;;  %s525_s3 = inlined_call_operand.vmem [shape: bf16[64,128], index: 3, kind: input, shape index: {}]   ;;  %s526_s5 = inlined_call_operand.vmem [shape: bf16[128,64], index: 5, kind: input, shape index: {}]   ;;  %s527_s1 = inlined_call_operand.vmem [shape: f32[1,64], index: 1, kind: input, shape index: {}]   ;;  %s528_s2 = inlined_call_operand.vmem [shape: f32[1,64], index: 2, kind: input, shape index: {}]   ;;  %s529_s4 = inlined_call_operand.vmem [shape: f32[1,128], index: 4, kind: input, shape index: {}]   ;;  %s530_s6 = inlined_call_operand.vmem [shape: f32[1,64], index: 6, kind: input, shape index: {}]   ;;  %s531_s7 = inlined_call_operand.vmem [shape: f32[16,64], index: 7, kind: output, shape index: {}]  }
   0x1   :  { %v426_v0 = vld [vmem:[%s524_s0] sm:$0xff]  ;;  %v431_v1 = vld [vmem:[%s524_s0 + $0x8] sm:$0xff]  ;;  %327 = vmatprep.subr.bf16.mxu0 %v381_v15  ;;  %339 = vmatprep.subr.bf16.mxu1 %v381_v15  ;;  %v363_v17 = vld [vmem:[%s525_s3 + $0x10] sm:$0xff]  }
   0x2   :  { %v32_v2 = vsel %vm31_vm0, %v426_v0, 0.0  ;;  %v35_v3 = vsel %vm31_vm0, %v431_v1, 0.0  ;;  %v361_v14 = vld [vmem:[%s525_s3] sm:$0xff]   ;;  %v362_v16 = vld [vmem:[%s525_s3 + $0x8] sm:$0xff]   ;;  %335 = vmatprep.mubr.msk.bf16.mxu0 %vm382_vm1, %v381_v15  ;;  %355 = vmatprep.mubr.msk.bf16.mxu1 %vm382_vm1, %v381_v15  ;;  %v364_v18 = vld [vmem:[%s525_s3 + $0x18] sm:$0xff]  }
   0x3   :  { %33 = vadd.xlane.f32.xlu0 %v32_v2  ;;  %328 = vmatpush3.bf16.msra.mxu0 %v361_v14  ;;  %v365_v19 = vld [vmem:[%s526_s5] sm:$0xff]   ;;  %v366_v20 = vld [vmem:[%s526_s5 + $0x8] sm:$0xff]   ;;  %v367_v21 = vld [vmem:[%s526_s5 + $0x10] sm:$0xff]  }
   0x4   :  { %329 = vmatprep.subr.bf16.mxu0 %v381_v15  ;;  %340 = vmatpush3.bf16.msra.mxu1 %v365_v19  ;;  %v368_v22 = vld [vmem:[%s526_s5 + $0x18] sm:$0xff]   ;;  %v369_v23 = vld [vmem:[%s526_s5 + $0x20] sm:$0xff]   ;;  %v370_v24 = vld [vmem:[%s526_s5 + $0x28] sm:$0xff]  }
   0x5   :  { %341 = vmatprep.subr.bf16.mxu1 %v381_v15  ;;  %v296_v41 = vld [vmem:[%s527_s1] ss:$0 sm:$0xff]  ;;  %v371_v52 = vld [vmem:[%s526_s5 + $0x30] sm:$0xff]   ;;  %v372_v53 = vld [vmem:[%s526_s5 + $0x38] sm:$0xff]  }
   0x6   :  { %v297_v47 = vld [vmem:[%s528_s2] ss:$0 sm:$0xff] }
   0x7   :  { %36 = vadd.xlane.f32.xlu0 %v35_v3  ;;  %330 = vmatpush3.bf16.msra.mxu0 %v362_v16  ;;  %v298_v54 = vld [vmem:[%s529_s4] ss:$0 sm:$0xff] }
   0x8   :  { %331 = vmatprep.subr.bf16.mxu0 %v381_v15  ;;  %342 = vmatpush3.bf16.msra.mxu1 %v366_v20  ;;  %v304_v2 = vld [vmem:[%s530_s6] ss:$0 sm:$0xff] }
   0x9   :  { %343 = vmatprep.subr.bf16.mxu1 %v381_v15 }
   0xb   :  { %332 = vmatpush3.bf16.msra.mxu0 %v363_v17 }
   0xc   :  { %333 = vmatprep.subr.bf16.mxu0 %v381_v15  ;;  %344 = vmatpush3.bf16.msra.mxu1 %v367_v21 }
   0xd   :  { %345 = vmatprep.subr.bf16.mxu1 %v381_v15 }
   0xf   :  { %334 = vmatpush3.bf16.msra.mxu0 %v364_v18 }
  0x10   :  { %346 = vmatpush3.bf16.msra.mxu1 %v368_v22 }
  0x11   :  { %347 = vmatprep.subr.bf16.mxu1 %v381_v15 }
  0x14   :  { %348 = vmatpush3.bf16.msra.mxu1 %v369_v23 }
  0x15   :  { %349 = vmatprep.subr.bf16.mxu1 %v381_v15 }
  0x18   :  { %350 = vmatpush3.bf16.msra.mxu1 %v370_v24 }
  0x19   :  { %351 = vmatprep.subr.bf16.mxu1 %v381_v15 }
  0x1c   :  { %352 = vmatpush3.bf16.msra.mxu1 %v371_v52 }
  0x1d   :  { %353 = vmatprep.subr.bf16.mxu1 %v381_v15 }
  0x20   :  { %354 = vmatpush3.bf16.msra.mxu1 %v372_v53 }
  0x90   :  { %v34_v4 = vpop.xlane.xlu0 %33 }
  0x91   :  { %v39_v5 = vmul.f32 0.015625, %v34_v4 }
  0x93   :  { %v438_v6 = vsub.f32 %v426_v0, %v39_v5 }
  0x94   :  { %v37_v7 = vpop.xlane.xlu0 %36 }
  0x95   :  { %v40_v8 = vmul.f32 0.015625, %v37_v7  ;;  %v43_v9 = vmul.f32 %v438_v6, %v438_v6  ;;  %v77_v43 = vmul.f32 %v296_v41, %v438_v6 }
  0x97   :  { %v443_v10 = vsub.f32 %v431_v1, %v40_v8  ;;  %v45_v11 = vsel %vm31_vm0, %v43_v9, 0.0 }
  0x98   :  { %46 = vadd.xlane.f32.xlu1 %v45_v11 }
  0x99   :  { %v44_v12 = vmul.f32 %v443_v10, %v443_v10  ;;  %v78_v44 = vmul.f32 %v296_v41, %v443_v10 }
  0x9b   :  { %v48_v13 = vsel %vm31_vm0, %v44_v12, 0.0 }
  0x9c   :  { %49 = vadd.xlane.f32.xlu1 %v48_v13 }
 0x125   :  { %v47_v25 = vpop.xlane.xlu1 %46 }
 0x126   :  { %v51_v26 = vmul.f32 0.015873017, %v47_v25 }
 0x128   :  { %373 = vrsqrt.f32 %v51_v26  ;;  %vm55_vm2 = vcmp.eq.f32.partialorder %v51_v26, inf  ;;  %v58_v31 = vand.u32 2147483648, %v51_v26  ;;  %vm57_vm3 = vcmp.eq.f32.partialorder %v51_v26, 0.0 }
 0x129   :  { %v50_v27 = vpop.xlane.xlu1 %49 }
 0x12a   :  { %v52_v28 = vmul.f32 0.015873017, %v50_v27 }
 0x12c   :  { %375 = vrsqrt.f32 %v52_v28  ;;  %vm62_vm4 = vcmp.eq.f32.partialorder %v52_v28, inf  ;;  %v65_v37 = vand.u32 2147483648, %v52_v28  ;;  %vm64_vm5 = vcmp.eq.f32.partialorder %v52_v28, 0.0 }
 0x132   :  { %v374_v29 = vpop.eup %373 }
 0x133   :  { %v54_v30 = vmul.f32 %v374_v29, %v51_v26 }
 0x135   :  { %v56_v32 = vsel %vm55_vm2, %v51_v26, %v54_v30 }
 0x136   :  { %v376_v33 = vpop.eup %375  ;;  %v59_v34 = vsel %vm57_vm3, %v58_v31, %v56_v32 }
 0x137   :  { %v67_v35 = vadd.f32 1e-06, %v59_v34  ;;  %v61_v36 = vmul.f32 %v376_v33, %v52_v28 }
 0x139   :  { %377 = vrcp.f32 %v67_v35  ;;  %v63_v38 = vsel %vm62_vm4, %v52_v28, %v61_v36 }
 0x13a   :  { %v66_v39 = vsel %vm64_vm5, %v65_v37, %v63_v38 }
 0x13b   :  { %v68_v40 = vadd.f32 1e-06, %v66_v39 }
 0x13d   :  { %379 = vrcp.f32 %v68_v40 }
 0x143   :  { %v378_v42 = vpop.eup %377 }
 0x144   :  { %v79_v45 = vmul.f32 %v378_v42, %v77_v43 }
 0x146   :  { %v87_v49 = vadd.f32 %v297_v47, %v79_v45 }
 0x147   :  { %v380_v46 = vpop.eup %379 }
 0x148   :  { %v80_v48 = vmul.f32 %v380_v46, %v78_v44 }
 0x14a   :  { %v88_v50 = vadd.f32 %v297_v47, %v80_v48 }
 0x14c   :  { %v89_v51 = vpack.c.bf16 %v88_v50, %v87_v49 }
 0x14e   :  { %336 = vmatmul.mubr.msk.bf16.vlgmr.msra.gmra.mrb[0].mxu0 %vm31_vm0, %v89_v51 }
 0x221   :  { %v166_v55 = vpop.f32.mrb[0].mxu0 }
 0x222   :  { %v167_v56 = vadd.f32 %v298_v54, %v166_v55  ;;  %v337_v57 = vpop.f32.mrb[1].mxu0 }
 0x223   :  { %v169_v58 = vpop.f32.mrb[2].mxu0 }
 0x224   :  { %v170_v59 = vadd.f32 %v298_v54, %v169_v58  ;;  %v338_v60 = vpop.f32.mrb[3].mxu0  ;;  %v173_v61 = vmax.f32 %v167_v56, 0.0 }
 0x226   :  { %v174_v62 = vmax.f32 %v170_v59, 0.0 }
 0x228   :  { %v175_v63 = vpack.c.bf16 %v174_v62, %v173_v61 }
 0x22a   :  { %356 = vmatmul.mubr.bf16.vlgmr.msra.gmra.mrb[0].mxu1 %v175_v63 }
 0x2fd   :  { %v281_v3 = vpop.f32.mrb[0].mxu1 }
 0x2fe   :  { %v282_v4 = vadd.f32 %v304_v2, %v281_v3  ;;  %v357_v5 = vpop.f32.mrb[1].mxu1 }
 0x2ff   :  { %v284_v6 = vpop.f32.mrb[2].mxu1 }
 0x300   :  { %v288_v7 = vadd.f32 %v282_v4, %v426_v0  ;;  %v285_v8 = vadd.f32 %v304_v2, %v284_v6  ;;  %v358_v9 = vpop.f32.mrb[3].mxu1 }
 0x302   :  { %290 = vst.msk [vmem:[%s531_s7] sm:$0xff] %vm31_vm0, %v288_v7  ;;  %v289_v10 = vadd.f32 %v285_v8, %v431_v1 }
 0x304   :  { %291 = vst.msk [vmem:[%s531_s7 + $0x8] sm:$0xff] %vm31_vm0, %v289_v10 }

// kernel: transformer_encoder_forward.17
= control target key start
LH: loop header
LB: loop body
LE: loop exit
PB: predicated region body
PF: predicated region fallthrough
CT: control target
= control target key end

     0   :  { %vm19_vm0 = vcmask 523264   ;;  %s185_s0 = inlined_call_operand.vmem [shape: f32[16,64], index: 0, kind: input, shape index: {}]   ;;  %s186_s1 = inlined_call_operand.vmem [shape: f32[1,64], index: 1, kind: input, shape index: {}]   ;;  %s187_s2 = inlined_call_operand.vmem [shape: f32[1,64], index: 2, kind: input, shape index: {}]   ;;  %s188_s3 = inlined_call_operand.hbm [shape: f32[16,64], index: 3, kind: output, shape index: {}]  }
   0x1   :  { %v15_v0 = vld [vmem:[%s185_s0] sm:$0xff]  ;;  %v16_v1 = vld [vmem:[%s185_s0 + $0x8] sm:$0xff] }
   0x2   :  { %v20_v2 = vsel %vm19_vm0, %v15_v0, 0.0 }
   0x3   :  { %8 = vsyncpa [#allocation3], 0  ;;  %21 = vadd.xlane.f32.xlu0 %v20_v2  ;;  %v23_v3 = vsel %vm19_vm0, %v16_v1, 0.0  ;;  %v95_v30 = vld [vmem:[%s186_s1] ss:$0 sm:$0xff]  ;;  %s132_s19 = smov [#allocation2]  }
   0x4   :  { %v96_v33 = vld [vmem:[%s187_s2] ss:$0 sm:$0xff]  ;;  %s84_s20 = sshll.u32 %s132_s19, 4  ;;  %s85_s20 = int_to_ptr.vmem [resolvable:$true] %s84_s20 }
   0x5   :  { %s108_s1 = scalar_lea.vmem %s85_s20, 256  ;;  %p113_p1 = scmp.lt.s32.totalorder %s85_s20, %s85_s20 }
   0x6   :  { %p109_p0 = scmp.ne.s32.totalorder %s85_s20, %s108_s1  ;;  %p114_p2 = scmp.lt.s32.totalorder %s108_s1, %s108_s1 }
   0x7   :  { %24 = vadd.xlane.f32.xlu0 %v23_v3 }
   0x8   :  { %p115_p3 = por %p114_p2, %p113_p1 }
   0xa   :  { %p116_p4 = pnand %p115_p3, %p109_p0 }
  0x90   :  { %v22_v4 = vpop.xlane.xlu0 %21 }
  0x91   :  { %v27_v5 = vmul.f32 0.015625, %v22_v4 }
  0x93   :  { %v29_v6 = vsub.f32 %v15_v0, %v27_v5 }
  0x94   :  { %v25_v7 = vpop.xlane.xlu0 %24 }
  0x95   :  { %v28_v8 = vmul.f32 0.015625, %v25_v7  ;;  %v31_v9 = vmul.f32 %v29_v6, %v29_v6  ;;  %v65_v31 = vmul.f32 %v95_v30, %v29_v6 }
  0x97   :  { %v30_v10 = vsub.f32 %v16_v1, %v28_v8  ;;  %v33_v11 = vsel %vm19_vm0, %v31_v9, 0.0 }
  0x98   :  { %34 = vadd.xlane.f32.xlu1 %v33_v11 }
  0x99   :  { %v32_v12 = vmul.f32 %v30_v10, %v30_v10  ;;  %v66_v35 = vmul.f32 %v95_v30, %v30_v10 }
  0x9b   :  { %v36_v13 = vsel %vm19_vm0, %v32_v12, 0.0 }
  0x9c   :  { %37 = vadd.xlane.f32.xlu1 %v36_v13 }
 0x125   :  { %v35_v14 = vpop.xlane.xlu1 %34 }
 0x126   :  { %v39_v15 = vmul.f32 0.015873017, %v35_v14 }
 0x128   :  { %100 = vrsqrt.f32 %v39_v15  ;;  %vm43_vm1 = vcmp.eq.f32.partialorder %v39_v15, inf  ;;  %v46_v20 = vand.u32 2147483648, %v39_v15  ;;  %vm45_vm2 = vcmp.eq.f32.partialorder %v39_v15, 0.0 }
 0x129   :  { %v38_v16 = vpop.xlane.xlu1 %37 }
 0x12a   :  { %v40_v17 = vmul.f32 0.015873017, %v38_v16 }
 0x12c   :  { %102 = vrsqrt.f32 %v40_v17  ;;  %vm50_vm3 = vcmp.eq.f32.partialorder %v40_v17, inf  ;;  %v53_v26 = vand.u32 2147483648, %v40_v17  ;;  %vm52_vm4 = vcmp.eq.f32.partialorder %v40_v17, 0.0 }
 0x132   :  { %v101_v18 = vpop.eup %100 }
 0x133   :  { %v42_v19 = vmul.f32 %v101_v18, %v39_v15 }
 0x135   :  { %v44_v21 = vsel %vm43_vm1, %v39_v15, %v42_v19 }
 0x136   :  { %v103_v22 = vpop.eup %102  ;;  %v47_v23 = vsel %vm45_vm2, %v46_v20, %v44_v21 }
 0x137   :  { %v55_v24 = vadd.f32 1e-06, %v47_v23  ;;  %v49_v25 = vmul.f32 %v103_v22, %v40_v17 }
 0x139   :  { %104 = vrcp.f32 %v55_v24  ;;  %v51_v27 = vsel %vm50_vm3, %v40_v17, %v49_v25 }
 0x13a   :  { %v54_v28 = vsel %vm52_vm4, %v53_v26, %v51_v27 }
 0x13b   :  { %v56_v29 = vadd.f32 1e-06, %v54_v28 }
 0x13d   :  { %106 = vrcp.f32 %v56_v29 }
 0x143   :  { %v105_v32 = vpop.eup %104 }
 0x144   :  { %v67_v34 = vmul.f32 %v105_v32, %v65_v31 }
 0x146   :  { %v75_v36 = vadd.f32 %v96_v33, %v67_v34 }
 0x147   :  { %v107_v37 = vpop.eup %106 }
 0x148   :  { %v68_v38 = vmul.f32 %v107_v37, %v66_v35  ;;  %77 = vst.msk [vmem:[#allocation2] sm:$0xff] %vm19_vm0, %v75_v36 }
 0x14a   :  { %v76_v39 = vadd.f32 %v96_v33, %v68_v38 }
 0x14c   :  { %78 = vst.msk [vmem:[#allocation2 + $0x8] sm:$0xff] %vm19_vm0, %v76_v39 }
 0x14d   :  { %119 = shalt.err (!%p116_p4)
}
 0x14e   :  { %s120_s22 = scalar_lea.hbm %s188_s3, 256 }
 0x14f   :  { %p121_p5 = scmp.ne.s32.totalorder %s188_s3, %s120_s22  ;;  %p124_p6 = scmp.lt.u32.totalorder %s120_s22, %s188_s3 }
 0x151   :  { %p126_p7 = pnand %p124_p6, %p121_p5 }
 0x153   :  { %129 = shalt.err (!%p126_p7)
}
 0x154   :  { %s133_s27 = smov 128   ;;  %s134_s28 = smov 8  }
 0x155   :  { %90 = dma.vmem_to_hbm [thread:$0]  %s85_s20, 256, %s188_s3, [#allocation3], %s133_s27, %s133_s27, %s134_s28  }
 0x156   :  { %130 = dma.done.wait [#allocation3], 256  }
 0x157   :  { %131 = vsyncadd [#allocation3], 4294967040 }
 0x158   :  { %94 = vsyncpa [#allocation3], 1 }

</bundles_post_ra>
